<compile_context>
chip_gen: v7x
topology: tpu7x:2x2x1
jax: 0.10.0
libtpu: 0.0.40
codegen_flags: <defaults>
</compile_context>

<pallas_src>
import math

import jax
import jax.numpy as jnp
from jax.experimental import pallas as pl
from jax.experimental.pallas import tpu as pltpu  # noqa: F401  (TPU backend)

# ----------------------------- config --------------------------------------
VOCAB = 100
MAX_POS = 16
HIDDEN = 32
N_LAYERS = 2
N_HEADS = 4
D_HEAD = HIDDEN // N_HEADS
INTERMEDIATE = 64
LN_EPS = 1e-12
HEAD_PAD = 128          # lane-dense padded width of the CLS-head output


# --------------------------- in-kernel helpers ------------------------------
def _layer_norm(x, gamma, beta):
    # x: (R, H), gamma/beta: (1, H); all f32
    mean = jnp.mean(x, axis=-1, keepdims=True)
    var = jnp.mean((x - mean) ** 2, axis=-1, keepdims=True)
    inv = jax.lax.rsqrt(var + LN_EPS)
    return (x - mean) * inv * gamma + beta


def _gelu(x):
    # TODO(synk): HF BERT uses the exact erf GELU; tanh approximation used here
    # (erf lowering on Mosaic is not guaranteed).
    c = math.sqrt(2.0 / math.pi)
    return 0.5 * x * (1.0 + jnp.tanh(c * (x + 0.044715 * x * x * x)))


def _encoder_layer(x, attn_bias, wq, bq, wk, bk, wv, bv, wo, bo,
                   ln1g, ln1b, wi, bi, wf, bf, ln2g, ln2b):
    rows = x.shape[0]                                   # B*S
    xb = x.astype(jnp.bfloat16)

    q = jnp.dot(xb, wq, preferred_element_type=jnp.float32) + bq
    k = jnp.dot(xb, wk, preferred_element_type=jnp.float32) + bk
    v = jnp.dot(xb, wv, preferred_element_type=jnp.float32) + bv

    # head-major stacking: rows ordered (head, batch*seq) -> (N_HEADS*rows, D_HEAD)
    def to_head_major(t):
        return jnp.concatenate(
            [t[:, h * D_HEAD:(h + 1) * D_HEAD] for h in range(N_HEADS)],
            axis=0).astype(jnp.bfloat16)

    q_hm = to_head_major(q)
    k_hm = to_head_major(k)
    v_hm = to_head_major(v)

    # single scores matmul; invalid (cross-head / cross-batch / padded-key)
    # pairs are removed by the precomputed additive bias.
    scores = jax.lax.dot_general(
        q_hm, k_hm, (((1,), (1,)), ((), ())),
        preferred_element_type=jnp.float32)
    scores = scores * (1.0 / math.sqrt(D_HEAD)) + attn_bias

    m = jnp.max(scores, axis=-1, keepdims=True)
    p = jnp.exp(scores - m)
    p = p * pl.reciprocal(jnp.sum(p, axis=-1, keepdims=True), approx=True)

    ctx_hm = jnp.dot(p.astype(jnp.bfloat16), v_hm,
                     preferred_element_type=jnp.float32)      # (N_HEADS*rows, D_HEAD)
    # back to hidden layout (rows, H), then ONE output projection
    ctx = jnp.concatenate(
        [ctx_hm[h * rows:(h + 1) * rows, :] for h in range(N_HEADS)], axis=1)
    attn = jnp.dot(ctx.astype(jnp.bfloat16), wo,
                   preferred_element_type=jnp.float32) + bo

    h1 = _layer_norm(x + attn, ln1g, ln1b)

    inter = _gelu(jnp.dot(h1.astype(jnp.bfloat16), wi,
                          preferred_element_type=jnp.float32) + bi)
    ffn = jnp.dot(inter.astype(jnp.bfloat16), wf,
                  preferred_element_type=jnp.float32) + bf

    return _layer_norm(h1 + ffn, ln2g, ln2b)


# --------------------------- fused pallas kernel -----------------------------
def _bert_select_kernel(x_ref, bias_ref, eg_ref, eb_ref,
                        wq_ref, bq_ref, wk_ref, bk_ref, wv_ref, bv_ref,
                        wo_ref, bo_ref, l1g_ref, l1b_ref,
                        wi_ref, bi_ref, wf_ref, bf_ref, l2g_ref, l2b_ref,
                        hw_ref, o_ref):
    x = _layer_norm(x_ref[...], eg_ref[...], eb_ref[...])    # embeddings LN
    bias = bias_ref[...]
    for li in range(N_LAYERS):                               # static unroll
        x = _encoder_layer(
            x, bias,
            wq_ref[li], bq_ref[li], wk_ref[li], bk_ref[li],
            wv_ref[li], bv_ref[li], wo_ref[li], bo_ref[li],
            l1g_ref[li], l1b_ref[li],
            wi_ref[li], bi_ref[li], wf_ref[li], bf_ref[li],
            l2g_ref[li], l2b_ref[li])
    # lane-dense (rows, 128) logits; column 0 is the real Linear(H, 1) output.
    o_ref[...] = jnp.dot(x.astype(jnp.bfloat16), hw_ref[...],
                         preferred_element_type=jnp.float32)


def _full_spec(shape):
    return pl.BlockSpec(shape, lambda *_: (0,) * len(shape))


def bert_select_pallas(emb_flat, attn_bias, params):
    R = emb_flat.shape[0]                  # B*S
    A = attn_bias.shape[0]                 # N_HEADS*B*S
    L = N_LAYERS
    st = params["stacked"]
    in_specs = [
        _full_spec((R, HIDDEN)),                                    # embeddings
        _full_spec((A, A)),                                         # attn bias
        _full_spec((1, HIDDEN)), _full_spec((1, HIDDEN)),           # emb LN
        _full_spec((L, HIDDEN, HIDDEN)), _full_spec((L, 1, HIDDEN)),        # Wq,bq
        _full_spec((L, HIDDEN, HIDDEN)), _full_spec((L, 1, HIDDEN)),        # Wk,bk
        _full_spec((L, HIDDEN, HIDDEN)), _full_spec((L, 1, HIDDEN)),        # Wv,bv
        _full_spec((L, HIDDEN, HIDDEN)), _full_spec((L, 1, HIDDEN)),        # Wo,bo
        _full_spec((L, 1, HIDDEN)), _full_spec((L, 1, HIDDEN)),             # LN1
        _full_spec((L, HIDDEN, INTERMEDIATE)), _full_spec((L, 1, INTERMEDIATE)),
        _full_spec((L, INTERMEDIATE, HIDDEN)), _full_spec((L, 1, HIDDEN)),  # Wf,bf
        _full_spec((L, 1, HIDDEN)), _full_spec((L, 1, HIDDEN)),             # LN2
        _full_spec((HIDDEN, HEAD_PAD)),                                     # head W
    ]
    return pl.pallas_call(
        _bert_select_kernel,
        out_shape=jax.ShapeDtypeStruct((R, HEAD_PAD), jnp.float32),
        in_specs=in_specs,
        out_specs=_full_spec((R, HEAD_PAD)),
    )(emb_flat, attn_bias, params["emb_ln_g"], params["emb_ln_b"],
      st["wq"], st["bq"], st["wk"], st["bk"], st["wv"], st["bv"],
      st["wo"], st["bo"], st["ln1g"], st["ln1b"],
      st["wi"], st["bi"], st["wf"], st["bf"], st["ln2g"], st["ln2b"],
      params["head_w_pad"])


# ----------------------------- parameters -----------------------------------
def init_params(key):
    def nrm(k, shape, scale=0.02, dtype=jnp.bfloat16):
        return (scale * jax.random.normal(k, shape)).astype(dtype)

    keys = jax.random.split(key, 4 + N_LAYERS)
    head_w = nrm(keys[3], (HIDDEN, 1))                       # Linear(H,1,bias=False)
    head_w_pad = jnp.pad(head_w, ((0, 0), (0, HEAD_PAD - 1)))  # lane-dense pad

    params = {
        "word_emb": nrm(keys[0], (VOCAB, HIDDEN), dtype=jnp.float32),
        "pos_emb": nrm(keys[1], (MAX_POS, HIDDEN), dtype=jnp.float32),
        "type_emb": nrm(keys[2], (2, HIDDEN), dtype=jnp.float32),
        "emb_ln_g": jnp.ones((1, HIDDEN), jnp.float32),
        "emb_ln_b": jnp.zeros((1, HIDDEN), jnp.float32),
        "head_w_pad": head_w_pad,
    }

    wq, wk, wv, wo, wi, wf = ([] for _ in range(6))
    for li in range(N_LAYERS):
        k = jax.random.split(keys[4 + li], 6)
        wq.append(nrm(k[0], (HIDDEN, HIDDEN)))
        wk.append(nrm(k[1], (HIDDEN, HIDDEN)))
        wv.append(nrm(k[2], (HIDDEN, HIDDEN)))
        wo.append(nrm(k[3], (HIDDEN, HIDDEN)))
        wi.append(nrm(k[4], (HIDDEN, INTERMEDIATE)))
        wf.append(nrm(k[5], (INTERMEDIATE, HIDDEN)))

    zeros_h = jnp.zeros((N_LAYERS, 1, HIDDEN), jnp.float32)
    ones_h = jnp.ones((N_LAYERS, 1, HIDDEN), jnp.float32)
    params["stacked"] = {
        "wq": jnp.stack(wq), "bq": zeros_h,
        "wk": jnp.stack(wk), "bk": zeros_h,
        "wv": jnp.stack(wv), "bv": zeros_h,
        "wo": jnp.stack(wo), "bo": zeros_h,
        "ln1g": ones_h, "ln1b": zeros_h,
        "wi": jnp.stack(wi),
        "bi": jnp.zeros((N_LAYERS, 1, INTERMEDIATE), jnp.float32),
        "wf": jnp.stack(wf), "bf": zeros_h,
        "ln2g": ones_h, "ln2b": zeros_h,
    }
    return params


# ------------------------------ forward --------------------------------------
@jax.jit
def bert_select_forward(params, ids, mask):
    B, S = ids.shape
    # embedding gathers stay in plain-JAX glue
    emb = (jnp.take(params["word_emb"], ids, axis=0)
           + params["pos_emb"][:S][None, :, :]
           + params["type_emb"][0][None, None, :])          # (B, S, H) f32
    emb_flat = emb.reshape(B * S, HIDDEN)

    # additive attention bias for the head-major (head, batch, seq) ordering:
    #   0 for (same head, same batch) pairs, -1e9 across heads/batches,
    #   plus -10000 for padded keys (HF BERT semantics).
    mask_f = mask.astype(jnp.float32)                        # (B, S)
    hi = jnp.repeat(jnp.arange(N_HEADS), B * S)
    bi = jnp.tile(jnp.repeat(jnp.arange(B), S), N_HEADS)
    same = (hi[:, None] == hi[None, :]) & (bi[:, None] == bi[None, :])
    key_pad = jnp.tile((1.0 - mask_f).reshape(B * S), N_HEADS) * (-10000.0)
    attn_bias = jnp.where(same, 0.0, -1e9) + key_pad[None, :]  # (HBS, HBS) f32

    logits = bert_select_pallas(emb_flat, attn_bias, params)   # (B*S, 128)
    # CLS token (position 0 of each sequence), real head output is column 0.
    return logits.reshape(B, S, HEAD_PAD)[:, 0, :1]             # (B, 1) f32


# -------------------------------- main ---------------------------------------
if __name__ == "__main__":
    key = jax.random.PRNGKey(0)
    k_param, k_ids = jax.random.split(key)

    B, S = 2, 8
    params = init_params(k_param)
    ids = jax.random.randint(k_ids, (B, S), 0, VOCAB, dtype=jnp.int32)
    mask = jnp.array([[1, 1, 1, 1, 1, 1, 0, 0],
                      [1, 1, 1, 1, 0, 0, 0, 0]], dtype=jnp.int32)

    out = bert_select_forward(params, ids, mask)
    out = jax.block_until_ready(out)
    assert out.shape == (B, 1) and out.dtype == jnp.float32
    assert bool(jnp.all(jnp.isfinite(out)))
    print("KERNEL_OK")
</pallas_src>

<mosaic_0001>
module attributes {stable_mosaic.version = 11 : i64} {
  func.func @_bert_select_kernel(%arg0: memref<16x32xf32, #tpu.memory_space<vmem>>, %arg1: memref<64x64xf32, #tpu.memory_space<vmem>>, %arg2: memref<1x32xf32, #tpu.memory_space<vmem>>, %arg3: memref<1x32xf32, #tpu.memory_space<vmem>>, %arg4: memref<2x32x32xbf16, #tpu.memory_space<vmem>>, %arg5: memref<2x1x32xf32, #tpu.memory_space<vmem>>, %arg6: memref<2x32x32xbf16, #tpu.memory_space<vmem>>, %arg7: memref<2x1x32xf32, #tpu.memory_space<vmem>>, %arg8: memref<2x32x32xbf16, #tpu.memory_space<vmem>>, %arg9: memref<2x1x32xf32, #tpu.memory_space<vmem>>, %arg10: memref<2x32x32xbf16, #tpu.memory_space<vmem>>, %arg11: memref<2x1x32xf32, #tpu.memory_space<vmem>>, %arg12: memref<2x1x32xf32, #tpu.memory_space<vmem>>, %arg13: memref<2x1x32xf32, #tpu.memory_space<vmem>>, %arg14: memref<2x32x64xbf16, #tpu.memory_space<vmem>>, %arg15: memref<2x1x64xf32, #tpu.memory_space<vmem>>, %arg16: memref<2x64x32xbf16, #tpu.memory_space<vmem>>, %arg17: memref<2x1x32xf32, #tpu.memory_space<vmem>>, %arg18: memref<2x1x32xf32, #tpu.memory_space<vmem>>, %arg19: memref<2x1x32xf32, #tpu.memory_space<vmem>>, %arg20: memref<32x128xbf16, #tpu.memory_space<vmem>>, %arg21: memref<16x128xf32, #tpu.memory_space<vmem>>) attributes {dimension_semantics = [], scalar_prefetch = 0 : i64, scratch_operands = 0 : i64, tpu.core_type = #tpu.core_type<tc>} {
    %c0 = arith.constant 0 : index
    %c0_0 = arith.constant 0 : index
    %0 = vector.load %arg0[%c0, %c0_0] : memref<16x32xf32, #tpu.memory_space<vmem>>, vector<16x32xf32>
    %c0_1 = arith.constant 0 : index
    %c0_2 = arith.constant 0 : index
    %1 = vector.load %arg2[%c0_1, %c0_2] : memref<1x32xf32, #tpu.memory_space<vmem>>, vector<1x32xf32>
    %c0_3 = arith.constant 0 : index
    %c0_4 = arith.constant 0 : index
    %2 = vector.load %arg3[%c0_3, %c0_4] : memref<1x32xf32, #tpu.memory_space<vmem>>, vector<1x32xf32>
    %cst = arith.constant dense<0.000000e+00> : vector<16xf32>
    %3 = vector.multi_reduction <add>, %0, %cst [1] : vector<16x32xf32> to vector<16xf32>
    %4 = vector.shape_cast %3 : vector<16xf32> to vector<16x1xf32>
    %cst_5 = arith.constant 3.200000e+01 : f32
    %5 = vector.broadcast %cst_5 : f32 to vector<16x1xf32>
    %6 = arith.divf %4, %5 : vector<16x1xf32>
    %7 = vector.broadcast %6 : vector<16x1xf32> to vector<16x32xf32>
    %8 = arith.subf %0, %7 : vector<16x32xf32>
    %9 = arith.mulf %8, %8 : vector<16x32xf32>
    %cst_6 = arith.constant dense<0.000000e+00> : vector<16xf32>
    %10 = vector.multi_reduction <add>, %9, %cst_6 [1] : vector<16x32xf32> to vector<16xf32>
    %11 = vector.shape_cast %10 : vector<16xf32> to vector<16x1xf32>
    %cst_7 = arith.constant 3.200000e+01 : f32
    %12 = vector.broadcast %cst_7 : f32 to vector<16x1xf32>
    %13 = arith.divf %11, %12 : vector<16x1xf32>
    %cst_8 = arith.constant 9.99999996E-13 : f32
    %14 = vector.broadcast %cst_8 : f32 to vector<16x1xf32>
    %15 = arith.addf %13, %14 : vector<16x1xf32>
    %16 = math.rsqrt %15 : vector<16x1xf32>
    %17 = vector.broadcast %6 : vector<16x1xf32> to vector<16x32xf32>
    %18 = arith.subf %0, %17 : vector<16x32xf32>
    %19 = vector.broadcast %16 : vector<16x1xf32> to vector<16x32xf32>
    %20 = arith.mulf %18, %19 : vector<16x32xf32>
    %21 = vector.broadcast %1 : vector<1x32xf32> to vector<16x32xf32>
    %22 = arith.mulf %20, %21 : vector<16x32xf32>
    %23 = vector.broadcast %2 : vector<1x32xf32> to vector<16x32xf32>
    %24 = arith.addf %22, %23 : vector<16x32xf32>
    %c0_9 = arith.constant 0 : index
    %c0_10 = arith.constant 0 : index
    %25 = vector.load %arg1[%c0_9, %c0_10] : memref<64x64xf32, #tpu.memory_space<vmem>>, vector<64x64xf32>
    %c0_11 = arith.constant 0 : index
    %c0_12 = arith.constant 0 : index
    %c0_13 = arith.constant 0 : index
    %26 = vector.load %arg4[%c0_11, %c0_12, %c0_13] : memref<2x32x32xbf16, #tpu.memory_space<vmem>>, vector<1x32x32xbf16>
    %27 = vector.shape_cast %26 : vector<1x32x32xbf16> to vector<32x32xbf16>
    %c0_14 = arith.constant 0 : index
    %c0_15 = arith.constant 0 : index
    %c0_16 = arith.constant 0 : index
    %28 = vector.load %arg5[%c0_14, %c0_15, %c0_16] : memref<2x1x32xf32, #tpu.memory_space<vmem>>, vector<1x1x32xf32>
    %29 = vector.shape_cast %28 : vector<1x1x32xf32> to vector<1x32xf32>
    %c0_17 = arith.constant 0 : index
    %c0_18 = arith.constant 0 : index
    %c0_19 = arith.constant 0 : index
    %30 = vector.load %arg6[%c0_17, %c0_18, %c0_19] : memref<2x32x32xbf16, #tpu.memory_space<vmem>>, vector<1x32x32xbf16>
    %31 = vector.shape_cast %30 : vector<1x32x32xbf16> to vector<32x32xbf16>
    %c0_20 = arith.constant 0 : index
    %c0_21 = arith.constant 0 : index
    %c0_22 = arith.constant 0 : index
    %32 = vector.load %arg7[%c0_20, %c0_21, %c0_22] : memref<2x1x32xf32, #tpu.memory_space<vmem>>, vector<1x1x32xf32>
    %33 = vector.shape_cast %32 : vector<1x1x32xf32> to vector<1x32xf32>
    %c0_23 = arith.constant 0 : index
    %c0_24 = arith.constant 0 : index
    %c0_25 = arith.constant 0 : index
    %34 = vector.load %arg8[%c0_23, %c0_24, %c0_25] : memref<2x32x32xbf16, #tpu.memory_space<vmem>>, vector<1x32x32xbf16>
    %35 = vector.shape_cast %34 : vector<1x32x32xbf16> to vector<32x32xbf16>
    %c0_26 = arith.constant 0 : index
    %c0_27 = arith.constant 0 : index
    %c0_28 = arith.constant 0 : index
    %36 = vector.load %arg9[%c0_26, %c0_27, %c0_28] : memref<2x1x32xf32, #tpu.memory_space<vmem>>, vector<1x1x32xf32>
    %37 = vector.shape_cast %36 : vector<1x1x32xf32> to vector<1x32xf32>
    %c0_29 = arith.constant 0 : index
    %c0_30 = arith.constant 0 : index
    %c0_31 = arith.constant 0 : index
    %38 = vector.load %arg10[%c0_29, %c0_30, %c0_31] : memref<2x32x32xbf16, #tpu.memory_space<vmem>>, vector<1x32x32xbf16>
    %39 = vector.shape_cast %38 : vector<1x32x32xbf16> to vector<32x32xbf16>
    %c0_32 = arith.constant 0 : index
    %c0_33 = arith.constant 0 : index
    %c0_34 = arith.constant 0 : index
    %40 = vector.load %arg11[%c0_32, %c0_33, %c0_34] : memref<2x1x32xf32, #tpu.memory_space<vmem>>, vector<1x1x32xf32>
    %41 = vector.shape_cast %40 : vector<1x1x32xf32> to vector<1x32xf32>
    %c0_35 = arith.constant 0 : index
    %c0_36 = arith.constant 0 : index
    %c0_37 = arith.constant 0 : index
    %42 = vector.load %arg12[%c0_35, %c0_36, %c0_37] : memref<2x1x32xf32, #tpu.memory_space<vmem>>, vector<1x1x32xf32>
    %43 = vector.shape_cast %42 : vector<1x1x32xf32> to vector<1x32xf32>
    %c0_38 = arith.constant 0 : index
    %c0_39 = arith.constant 0 : index
    %c0_40 = arith.constant 0 : index
    %44 = vector.load %arg13[%c0_38, %c0_39, %c0_40] : memref<2x1x32xf32, #tpu.memory_space<vmem>>, vector<1x1x32xf32>
    %45 = vector.shape_cast %44 : vector<1x1x32xf32> to vector<1x32xf32>
    %c0_41 = arith.constant 0 : index
    %c0_42 = arith.constant 0 : index
    %c0_43 = arith.constant 0 : index
    %46 = vector.load %arg14[%c0_41, %c0_42, %c0_43] : memref<2x32x64xbf16, #tpu.memory_space<vmem>>, vector<1x32x64xbf16>
    %47 = vector.shape_cast %46 : vector<1x32x64xbf16> to vector<32x64xbf16>
    %c0_44 = arith.constant 0 : index
    %c0_45 = arith.constant 0 : index
    %c0_46 = arith.constant 0 : index
    %48 = vector.load %arg15[%c0_44, %c0_45, %c0_46] : memref<2x1x64xf32, #tpu.memory_space<vmem>>, vector<1x1x64xf32>
    %49 = vector.shape_cast %48 : vector<1x1x64xf32> to vector<1x64xf32>
    %c0_47 = arith.constant 0 : index
    %c0_48 = arith.constant 0 : index
    %c0_49 = arith.constant 0 : index
    %50 = vector.load %arg16[%c0_47, %c0_48, %c0_49] : memref<2x64x32xbf16, #tpu.memory_space<vmem>>, vector<1x64x32xbf16>
    %51 = vector.shape_cast %50 : vector<1x64x32xbf16> to vector<64x32xbf16>
    %c0_50 = arith.constant 0 : index
    %c0_51 = arith.constant 0 : index
    %c0_52 = arith.constant 0 : index
    %52 = vector.load %arg17[%c0_50, %c0_51, %c0_52] : memref<2x1x32xf32, #tpu.memory_space<vmem>>, vector<1x1x32xf32>
    %53 = vector.shape_cast %52 : vector<1x1x32xf32> to vector<1x32xf32>
    %c0_53 = arith.constant 0 : index
    %c0_54 = arith.constant 0 : index
    %c0_55 = arith.constant 0 : index
    %54 = vector.load %arg18[%c0_53, %c0_54, %c0_55] : memref<2x1x32xf32, #tpu.memory_space<vmem>>, vector<1x1x32xf32>
    %55 = vector.shape_cast %54 : vector<1x1x32xf32> to vector<1x32xf32>
    %c0_56 = arith.constant 0 : index
    %c0_57 = arith.constant 0 : index
    %c0_58 = arith.constant 0 : index
    %56 = vector.load %arg19[%c0_56, %c0_57, %c0_58] : memref<2x1x32xf32, #tpu.memory_space<vmem>>, vector<1x1x32xf32>
    %57 = vector.shape_cast %56 : vector<1x1x32xf32> to vector<1x32xf32>
    %58 = arith.truncf %24 : vector<16x32xf32> to vector<16x32xbf16>
    %cst_59 = arith.constant dense<0.000000e+00> : vector<16x32xf32>
    %59 = tpu.matmul %58, %27, %cst_59 {dimension_numbers = #tpu.dot_dimension_numbers<[1], [0], [0], [1], [0, 0, 1, 1], [], []>} : vector<16x32xbf16>, vector<32x32xbf16>, vector<16x32xf32> -> vector<16x32xf32>
    %60 = vector.broadcast %29 : vector<1x32xf32> to vector<16x32xf32>
    %61 = arith.addf %59, %60 : vector<16x32xf32>
    %cst_60 = arith.constant dense<0.000000e+00> : vector<16x32xf32>
    %62 = tpu.matmul %58, %31, %cst_60 {dimension_numbers = #tpu.dot_dimension_numbers<[1], [0], [0], [1], [0, 0, 1, 1], [], []>} : vector<16x32xbf16>, vector<32x32xbf16>, vector<16x32xf32> -> vector<16x32xf32>
    %63 = vector.broadcast %33 : vector<1x32xf32> to vector<16x32xf32>
    %64 = arith.addf %62, %63 : vector<16x32xf32>
    %cst_61 = arith.constant dense<0.000000e+00> : vector<16x32xf32>
    %65 = tpu.matmul %58, %35, %cst_61 {dimension_numbers = #tpu.dot_dimension_numbers<[1], [0], [0], [1], [0, 0, 1, 1], [], []>} : vector<16x32xbf16>, vector<32x32xbf16>, vector<16x32xf32> -> vector<16x32xf32>
    %66 = vector.broadcast %37 : vector<1x32xf32> to vector<16x32xf32>
    %67 = arith.addf %65, %66 : vector<16x32xf32>
    %68 = vector.extract_strided_slice %61 {offsets = [0, 0], sizes = [16, 8], strides = [1, 1]} : vector<16x32xf32> to vector<16x8xf32>
    %69 = vector.extract_strided_slice %61 {offsets = [0, 8], sizes = [16, 8], strides = [1, 1]} : vector<16x32xf32> to vector<16x8xf32>
    %70 = vector.extract_strided_slice %61 {offsets = [0, 16], sizes = [16, 8], strides = [1, 1]} : vector<16x32xf32> to vector<16x8xf32>
    %71 = vector.extract_strided_slice %61 {offsets = [0, 24], sizes = [16, 8], strides = [1, 1]} : vector<16x32xf32> to vector<16x8xf32>
    %72 = tpu.concatenate %68, %69, %70, %71 in 0 : vector<16x8xf32>, vector<16x8xf32>, vector<16x8xf32>, vector<16x8xf32> -> vector<64x8xf32>
    %73 = arith.truncf %72 : vector<64x8xf32> to vector<64x8xbf16>
    %74 = vector.extract_strided_slice %64 {offsets = [0, 0], sizes = [16, 8], strides = [1, 1]} : vector<16x32xf32> to vector<16x8xf32>
    %75 = vector.extract_strided_slice %64 {offsets = [0, 8], sizes = [16, 8], strides = [1, 1]} : vector<16x32xf32> to vector<16x8xf32>
    %76 = vector.extract_strided_slice %64 {offsets = [0, 16], sizes = [16, 8], strides = [1, 1]} : vector<16x32xf32> to vector<16x8xf32>
    %77 = vector.extract_strided_slice %64 {offsets = [0, 24], sizes = [16, 8], strides = [1, 1]} : vector<16x32xf32> to vector<16x8xf32>
    %78 = tpu.concatenate %74, %75, %76, %77 in 0 : vector<16x8xf32>, vector<16x8xf32>, vector<16x8xf32>, vector<16x8xf32> -> vector<64x8xf32>
    %79 = arith.truncf %78 : vector<64x8xf32> to vector<64x8xbf16>
    %80 = vector.extract_strided_slice %67 {offsets = [0, 0], sizes = [16, 8], strides = [1, 1]} : vector<16x32xf32> to vector<16x8xf32>
    %81 = vector.extract_strided_slice %67 {offsets = [0, 8], sizes = [16, 8], strides = [1, 1]} : vector<16x32xf32> to vector<16x8xf32>
    %82 = vector.extract_strided_slice %67 {offsets = [0, 16], sizes = [16, 8], strides = [1, 1]} : vector<16x32xf32> to vector<16x8xf32>
    %83 = vector.extract_strided_slice %67 {offsets = [0, 24], sizes = [16, 8], strides = [1, 1]} : vector<16x32xf32> to vector<16x8xf32>
    %84 = tpu.concatenate %80, %81, %82, %83 in 0 : vector<16x8xf32>, vector<16x8xf32>, vector<16x8xf32>, vector<16x8xf32> -> vector<64x8xf32>
    %85 = arith.truncf %84 : vector<64x8xf32> to vector<64x8xbf16>
    %cst_62 = arith.constant dense<0.000000e+00> : vector<64x64xf32>
    %86 = tpu.matmul %73, %79, %cst_62 {dimension_numbers = #tpu.dot_dimension_numbers<[1], [1], [0], [0], [0, 0, 1, 0], [], []>} : vector<64x8xbf16>, vector<64x8xbf16>, vector<64x64xf32> -> vector<64x64xf32>
    %cst_63 = arith.constant 0.353553385 : f32
    %87 = vector.broadcast %cst_63 : f32 to vector<64x64xf32>
    %88 = arith.mulf %86, %87 : vector<64x64xf32>
    %89 = arith.addf %88, %25 : vector<64x64xf32>
    %cst_64 = arith.constant dense<0xFF800000> : vector<64xf32>
    %90 = vector.multi_reduction <maximumf>, %89, %cst_64 [1] : vector<64x64xf32> to vector<64xf32>
    %91 = vector.shape_cast %90 : vector<64xf32> to vector<64x1xf32>
    %92 = vector.broadcast %91 : vector<64x1xf32> to vector<64x64xf32>
    %93 = arith.subf %89, %92 : vector<64x64xf32>
    %94 = math.exp %93 : vector<64x64xf32>
    %cst_65 = arith.constant dense<0.000000e+00> : vector<64xf32>
    %95 = vector.multi_reduction <add>, %94, %cst_65 [1] : vector<64x64xf32> to vector<64xf32>
    %96 = vector.shape_cast %95 : vector<64xf32> to vector<64x1xf32>
    %97 = tpu.reciprocal %96 {approx = true} : vector<64x1xf32> -> vector<64x1xf32>
    %98 = vector.broadcast %97 : vector<64x1xf32> to vector<64x64xf32>
    %99 = arith.mulf %94, %98 : vector<64x64xf32>
    %100 = arith.truncf %99 : vector<64x64xf32> to vector<64x64xbf16>
    %cst_66 = arith.constant dense<0.000000e+00> : vector<64x8xf32>
    %101 = tpu.matmul %100, %85, %cst_66 {dimension_numbers = #tpu.dot_dimension_numbers<[1], [0], [0], [1], [0, 0, 1, 1], [], []>} : vector<64x64xbf16>, vector<64x8xbf16>, vector<64x8xf32> -> vector<64x8xf32>
    %102 = vector.extract_strided_slice %101 {offsets = [0, 0], sizes = [16, 8], strides = [1, 1]} : vector<64x8xf32> to vector<16x8xf32>
    %103 = vector.extract_strided_slice %101 {offsets = [16, 0], sizes = [16, 8], strides = [1, 1]} : vector<64x8xf32> to vector<16x8xf32>
    %104 = vector.extract_strided_slice %101 {offsets = [32, 0], sizes = [16, 8], strides = [1, 1]} : vector<64x8xf32> to vector<16x8xf32>
    %105 = vector.extract_strided_slice %101 {offsets = [48, 0], sizes = [16, 8], strides = [1, 1]} : vector<64x8xf32> to vector<16x8xf32>
    %106 = tpu.concatenate %102, %103, %104, %105 in 1 : vector<16x8xf32>, vector<16x8xf32>, vector<16x8xf32>, vector<16x8xf32> -> vector<16x32xf32>
    %107 = arith.truncf %106 : vector<16x32xf32> to vector<16x32xbf16>
    %cst_67 = arith.constant dense<0.000000e+00> : vector<16x32xf32>
    %108 = tpu.matmul %107, %39, %cst_67 {dimension_numbers = #tpu.dot_dimension_numbers<[1], [0], [0], [1], [0, 0, 1, 1], [], []>} : vector<16x32xbf16>, vector<32x32xbf16>, vector<16x32xf32> -> vector<16x32xf32>
    %109 = vector.broadcast %41 : vector<1x32xf32> to vector<16x32xf32>
    %110 = arith.addf %108, %109 : vector<16x32xf32>
    %111 = arith.addf %24, %110 : vector<16x32xf32>
    %cst_68 = arith.constant dense<0.000000e+00> : vector<16xf32>
    %112 = vector.multi_reduction <add>, %111, %cst_68 [1] : vector<16x32xf32> to vector<16xf32>
    %113 = vector.shape_cast %112 : vector<16xf32> to vector<16x1xf32>
    %cst_69 = arith.constant 3.200000e+01 : f32
    %114 = vector.broadcast %cst_69 : f32 to vector<16x1xf32>
    %115 = arith.divf %113, %114 : vector<16x1xf32>
    %116 = vector.broadcast %115 : vector<16x1xf32> to vector<16x32xf32>
    %117 = arith.subf %111, %116 : vector<16x32xf32>
    %118 = arith.mulf %117, %117 : vector<16x32xf32>
    %cst_70 = arith.constant dense<0.000000e+00> : vector<16xf32>
    %119 = vector.multi_reduction <add>, %118, %cst_70 [1] : vector<16x32xf32> to vector<16xf32>
    %120 = vector.shape_cast %119 : vector<16xf32> to vector<16x1xf32>
    %cst_71 = arith.constant 3.200000e+01 : f32
    %121 = vector.broadcast %cst_71 : f32 to vector<16x1xf32>
    %122 = arith.divf %120, %121 : vector<16x1xf32>
    %cst_72 = arith.constant 9.99999996E-13 : f32
    %123 = vector.broadcast %cst_72 : f32 to vector<16x1xf32>
    %124 = arith.addf %122, %123 : vector<16x1xf32>
    %125 = math.rsqrt %124 : vector<16x1xf32>
    %126 = vector.broadcast %115 : vector<16x1xf32> to vector<16x32xf32>
    %127 = arith.subf %111, %126 : vector<16x32xf32>
    %128 = vector.broadcast %125 : vector<16x1xf32> to vector<16x32xf32>
    %129 = arith.mulf %127, %128 : vector<16x32xf32>
    %130 = vector.broadcast %43 : vector<1x32xf32> to vector<16x32xf32>
    %131 = arith.mulf %129, %130 : vector<16x32xf32>
    %132 = vector.broadcast %45 : vector<1x32xf32> to vector<16x32xf32>
    %133 = arith.addf %131, %132 : vector<16x32xf32>
    %134 = arith.truncf %133 : vector<16x32xf32> to vector<16x32xbf16>
    %cst_73 = arith.constant dense<0.000000e+00> : vector<16x64xf32>
    %135 = tpu.matmul %134, %47, %cst_73 {dimension_numbers = #tpu.dot_dimension_numbers<[1], [0], [0], [1], [0, 0, 1, 1], [], []>} : vector<16x32xbf16>, vector<32x64xbf16>, vector<16x64xf32> -> vector<16x64xf32>
    %136 = vector.broadcast %49 : vector<1x64xf32> to vector<16x64xf32>
    %137 = arith.addf %135, %136 : vector<16x64xf32>
    %cst_74 = arith.constant 5.000000e-01 : f32
    %138 = vector.broadcast %cst_74 : f32 to vector<16x64xf32>
    %139 = arith.mulf %138, %137 : vector<16x64xf32>
    %cst_75 = arith.constant 4.471500e-02 : f32
    %140 = vector.broadcast %cst_75 : f32 to vector<16x64xf32>
    %141 = arith.mulf %140, %137 : vector<16x64xf32>
    %142 = arith.mulf %141, %137 : vector<16x64xf32>
    %143 = arith.mulf %142, %137 : vector<16x64xf32>
    %144 = arith.addf %137, %143 : vector<16x64xf32>
    %cst_76 = arith.constant 0.797884583 : f32
    %145 = vector.broadcast %cst_76 : f32 to vector<16x64xf32>
    %146 = arith.mulf %145, %144 : vector<16x64xf32>
    %147 = math.tanh %146 : vector<16x64xf32>
    %cst_77 = arith.constant 1.000000e+00 : f32
    %148 = vector.broadcast %cst_77 : f32 to vector<16x64xf32>
    %149 = arith.addf %148, %147 : vector<16x64xf32>
    %150 = arith.mulf %139, %149 : vector<16x64xf32>
    %151 = arith.truncf %150 : vector<16x64xf32> to vector<16x64xbf16>
    %cst_78 = arith.constant dense<0.000000e+00> : vector<16x32xf32>
    %152 = tpu.matmul %151, %51, %cst_78 {dimension_numbers = #tpu.dot_dimension_numbers<[1], [0], [0], [1], [0, 0, 1, 1], [], []>} : vector<16x64xbf16>, vector<64x32xbf16>, vector<16x32xf32> -> vector<16x32xf32>
    %153 = vector.broadcast %53 : vector<1x32xf32> to vector<16x32xf32>
    %154 = arith.addf %152, %153 : vector<16x32xf32>
    %155 = arith.addf %133, %154 : vector<16x32xf32>
    %cst_79 = arith.constant dense<0.000000e+00> : vector<16xf32>
    %156 = vector.multi_reduction <add>, %155, %cst_79 [1] : vector<16x32xf32> to vector<16xf32>
    %157 = vector.shape_cast %156 : vector<16xf32> to vector<16x1xf32>
    %cst_80 = arith.constant 3.200000e+01 : f32
    %158 = vector.broadcast %cst_80 : f32 to vector<16x1xf32>
    %159 = arith.divf %157, %158 : vector<16x1xf32>
    %160 = vector.broadcast %159 : vector<16x1xf32> to vector<16x32xf32>
    %161 = arith.subf %155, %160 : vector<16x32xf32>
    %162 = arith.mulf %161, %161 : vector<16x32xf32>
    %cst_81 = arith.constant dense<0.000000e+00> : vector<16xf32>
    %163 = vector.multi_reduction <add>, %162, %cst_81 [1] : vector<16x32xf32> to vector<16xf32>
    %164 = vector.shape_cast %163 : vector<16xf32> to vector<16x1xf32>
    %cst_82 = arith.constant 3.200000e+01 : f32
    %165 = vector.broadcast %cst_82 : f32 to vector<16x1xf32>
    %166 = arith.divf %164, %165 : vector<16x1xf32>
    %cst_83 = arith.constant 9.99999996E-13 : f32
    %167 = vector.broadcast %cst_83 : f32 to vector<16x1xf32>
    %168 = arith.addf %166, %167 : vector<16x1xf32>
    %169 = math.rsqrt %168 : vector<16x1xf32>
    %170 = vector.broadcast %159 : vector<16x1xf32> to vector<16x32xf32>
    %171 = arith.subf %155, %170 : vector<16x32xf32>
    %172 = vector.broadcast %169 : vector<16x1xf32> to vector<16x32xf32>
    %173 = arith.mulf %171, %172 : vector<16x32xf32>
    %174 = vector.broadcast %55 : vector<1x32xf32> to vector<16x32xf32>
    %175 = arith.mulf %173, %174 : vector<16x32xf32>
    %176 = vector.broadcast %57 : vector<1x32xf32> to vector<16x32xf32>
    %177 = arith.addf %175, %176 : vector<16x32xf32>
    %c1 = arith.constant 1 : index
    %c0_84 = arith.constant 0 : index
    %c0_85 = arith.constant 0 : index
    %178 = vector.load %arg4[%c1, %c0_84, %c0_85] : memref<2x32x32xbf16, #tpu.memory_space<vmem>>, vector<1x32x32xbf16>
    %179 = vector.shape_cast %178 : vector<1x32x32xbf16> to vector<32x32xbf16>
    %c1_86 = arith.constant 1 : index
    %c0_87 = arith.constant 0 : index
    %c0_88 = arith.constant 0 : index
    %180 = vector.load %arg5[%c1_86, %c0_87, %c0_88] : memref<2x1x32xf32, #tpu.memory_space<vmem>>, vector<1x1x32xf32>
    %181 = vector.shape_cast %180 : vector<1x1x32xf32> to vector<1x32xf32>
    %c1_89 = arith.constant 1 : index
    %c0_90 = arith.constant 0 : index
    %c0_91 = arith.constant 0 : index
    %182 = vector.load %arg6[%c1_89, %c0_90, %c0_91] : memref<2x32x32xbf16, #tpu.memory_space<vmem>>, vector<1x32x32xbf16>
    %183 = vector.shape_cast %182 : vector<1x32x32xbf16> to vector<32x32xbf16>
    %c1_92 = arith.constant 1 : index
    %c0_93 = arith.constant 0 : index
    %c0_94 = arith.constant 0 : index
    %184 = vector.load %arg7[%c1_92, %c0_93, %c0_94] : memref<2x1x32xf32, #tpu.memory_space<vmem>>, vector<1x1x32xf32>
    %185 = vector.shape_cast %184 : vector<1x1x32xf32> to vector<1x32xf32>
    %c1_95 = arith.constant 1 : index
    %c0_96 = arith.constant 0 : index
    %c0_97 = arith.constant 0 : index
    %186 = vector.load %arg8[%c1_95, %c0_96, %c0_97] : memref<2x32x32xbf16, #tpu.memory_space<vmem>>, vector<1x32x32xbf16>
    %187 = vector.shape_cast %186 : vector<1x32x32xbf16> to vector<32x32xbf16>
    %c1_98 = arith.constant 1 : index
    %c0_99 = arith.constant 0 : index
    %c0_100 = arith.constant 0 : index
    %188 = vector.load %arg9[%c1_98, %c0_99, %c0_100] : memref<2x1x32xf32, #tpu.memory_space<vmem>>, vector<1x1x32xf32>
    %189 = vector.shape_cast %188 : vector<1x1x32xf32> to vector<1x32xf32>
    %c1_101 = arith.constant 1 : index
    %c0_102 = arith.constant 0 : index
    %c0_103 = arith.constant 0 : index
    %190 = vector.load %arg10[%c1_101, %c0_102, %c0_103] : memref<2x32x32xbf16, #tpu.memory_space<vmem>>, vector<1x32x32xbf16>
    %191 = vector.shape_cast %190 : vector<1x32x32xbf16> to vector<32x32xbf16>
    %c1_104 = arith.constant 1 : index
    %c0_105 = arith.constant 0 : index
    %c0_106 = arith.constant 0 : index
    %192 = vector.load %arg11[%c1_104, %c0_105, %c0_106] : memref<2x1x32xf32, #tpu.memory_space<vmem>>, vector<1x1x32xf32>
    %193 = vector.shape_cast %192 : vector<1x1x32xf32> to vector<1x32xf32>
    %c1_107 = arith.constant 1 : index
    %c0_108 = arith.constant 0 : index
    %c0_109 = arith.constant 0 : index
    %194 = vector.load %arg12[%c1_107, %c0_108, %c0_109] : memref<2x1x32xf32, #tpu.memory_space<vmem>>, vector<1x1x32xf32>
    %195 = vector.shape_cast %194 : vector<1x1x32xf32> to vector<1x32xf32>
    %c1_110 = arith.constant 1 : index
    %c0_111 = arith.constant 0 : index
    %c0_112 = arith.constant 0 : index
    %196 = vector.load %arg13[%c1_110, %c0_111, %c0_112] : memref<2x1x32xf32, #tpu.memory_space<vmem>>, vector<1x1x32xf32>
    %197 = vector.shape_cast %196 : vector<1x1x32xf32> to vector<1x32xf32>
    %c1_113 = arith.constant 1 : index
    %c0_114 = arith.constant 0 : index
    %c0_115 = arith.constant 0 : index
    %198 = vector.load %arg14[%c1_113, %c0_114, %c0_115] : memref<2x32x64xbf16, #tpu.memory_space<vmem>>, vector<1x32x64xbf16>
    %199 = vector.shape_cast %198 : vector<1x32x64xbf16> to vector<32x64xbf16>
    %c1_116 = arith.constant 1 : index
    %c0_117 = arith.constant 0 : index
    %c0_118 = arith.constant 0 : index
    %200 = vector.load %arg15[%c1_116, %c0_117, %c0_118] : memref<2x1x64xf32, #tpu.memory_space<vmem>>, vector<1x1x64xf32>
    %201 = vector.shape_cast %200 : vector<1x1x64xf32> to vector<1x64xf32>
    %c1_119 = arith.constant 1 : index
    %c0_120 = arith.constant 0 : index
    %c0_121 = arith.constant 0 : index
    %202 = vector.load %arg16[%c1_119, %c0_120, %c0_121] : memref<2x64x32xbf16, #tpu.memory_space<vmem>>, vector<1x64x32xbf16>
    %203 = vector.shape_cast %202 : vector<1x64x32xbf16> to vector<64x32xbf16>
    %c1_122 = arith.constant 1 : index
    %c0_123 = arith.constant 0 : index
    %c0_124 = arith.constant 0 : index
    %204 = vector.load %arg17[%c1_122, %c0_123, %c0_124] : memref<2x1x32xf32, #tpu.memory_space<vmem>>, vector<1x1x32xf32>
    %205 = vector.shape_cast %204 : vector<1x1x32xf32> to vector<1x32xf32>
    %c1_125 = arith.constant 1 : index
    %c0_126 = arith.constant 0 : index
    %c0_127 = arith.constant 0 : index
    %206 = vector.load %arg18[%c1_125, %c0_126, %c0_127] : memref<2x1x32xf32, #tpu.memory_space<vmem>>, vector<1x1x32xf32>
    %207 = vector.shape_cast %206 : vector<1x1x32xf32> to vector<1x32xf32>
    %c1_128 = arith.constant 1 : index
    %c0_129 = arith.constant 0 : index
    %c0_130 = arith.constant 0 : index
    %208 = vector.load %arg19[%c1_128, %c0_129, %c0_130] : memref<2x1x32xf32, #tpu.memory_space<vmem>>, vector<1x1x32xf32>
    %209 = vector.shape_cast %208 : vector<1x1x32xf32> to vector<1x32xf32>
    %210 = arith.truncf %177 : vector<16x32xf32> to vector<16x32xbf16>
    %cst_131 = arith.constant dense<0.000000e+00> : vector<16x32xf32>
    %211 = tpu.matmul %210, %179, %cst_131 {dimension_numbers = #tpu.dot_dimension_numbers<[1], [0], [0], [1], [0, 0, 1, 1], [], []>} : vector<16x32xbf16>, vector<32x32xbf16>, vector<16x32xf32> -> vector<16x32xf32>
    %212 = vector.broadcast %181 : vector<1x32xf32> to vector<16x32xf32>
    %213 = arith.addf %211, %212 : vector<16x32xf32>
    %cst_132 = arith.constant dense<0.000000e+00> : vector<16x32xf32>
    %214 = tpu.matmul %210, %183, %cst_132 {dimension_numbers = #tpu.dot_dimension_numbers<[1], [0], [0], [1], [0, 0, 1, 1], [], []>} : vector<16x32xbf16>, vector<32x32xbf16>, vector<16x32xf32> -> vector<16x32xf32>
    %215 = vector.broadcast %185 : vector<1x32xf32> to vector<16x32xf32>
    %216 = arith.addf %214, %215 : vector<16x32xf32>
    %cst_133 = arith.constant dense<0.000000e+00> : vector<16x32xf32>
    %217 = tpu.matmul %210, %187, %cst_133 {dimension_numbers = #tpu.dot_dimension_numbers<[1], [0], [0], [1], [0, 0, 1, 1], [], []>} : vector<16x32xbf16>, vector<32x32xbf16>, vector<16x32xf32> -> vector<16x32xf32>
    %218 = vector.broadcast %189 : vector<1x32xf32> to vector<16x32xf32>
    %219 = arith.addf %217, %218 : vector<16x32xf32>
    %220 = vector.extract_strided_slice %213 {offsets = [0, 0], sizes = [16, 8], strides = [1, 1]} : vector<16x32xf32> to vector<16x8xf32>
    %221 = vector.extract_strided_slice %213 {offsets = [0, 8], sizes = [16, 8], strides = [1, 1]} : vector<16x32xf32> to vector<16x8xf32>
    %222 = vector.extract_strided_slice %213 {offsets = [0, 16], sizes = [16, 8], strides = [1, 1]} : vector<16x32xf32> to vector<16x8xf32>
    %223 = vector.extract_strided_slice %213 {offsets = [0, 24], sizes = [16, 8], strides = [1, 1]} : vector<16x32xf32> to vector<16x8xf32>
    %224 = tpu.concatenate %220, %221, %222, %223 in 0 : vector<16x8xf32>, vector<16x8xf32>, vector<16x8xf32>, vector<16x8xf32> -> vector<64x8xf32>
    %225 = arith.truncf %224 : vector<64x8xf32> to vector<64x8xbf16>
    %226 = vector.extract_strided_slice %216 {offsets = [0, 0], sizes = [16, 8], strides = [1, 1]} : vector<16x32xf32> to vector<16x8xf32>
    %227 = vector.extract_strided_slice %216 {offsets = [0, 8], sizes = [16, 8], strides = [1, 1]} : vector<16x32xf32> to vector<16x8xf32>
    %228 = vector.extract_strided_slice %216 {offsets = [0, 16], sizes = [16, 8], strides = [1, 1]} : vector<16x32xf32> to vector<16x8xf32>
    %229 = vector.extract_strided_slice %216 {offsets = [0, 24], sizes = [16, 8], strides = [1, 1]} : vector<16x32xf32> to vector<16x8xf32>
    %230 = tpu.concatenate %226, %227, %228, %229 in 0 : vector<16x8xf32>, vector<16x8xf32>, vector<16x8xf32>, vector<16x8xf32> -> vector<64x8xf32>
    %231 = arith.truncf %230 : vector<64x8xf32> to vector<64x8xbf16>
    %232 = vector.extract_strided_slice %219 {offsets = [0, 0], sizes = [16, 8], strides = [1, 1]} : vector<16x32xf32> to vector<16x8xf32>
    %233 = vector.extract_strided_slice %219 {offsets = [0, 8], sizes = [16, 8], strides = [1, 1]} : vector<16x32xf32> to vector<16x8xf32>
    %234 = vector.extract_strided_slice %219 {offsets = [0, 16], sizes = [16, 8], strides = [1, 1]} : vector<16x32xf32> to vector<16x8xf32>
    %235 = vector.extract_strided_slice %219 {offsets = [0, 24], sizes = [16, 8], strides = [1, 1]} : vector<16x32xf32> to vector<16x8xf32>
    %236 = tpu.concatenate %232, %233, %234, %235 in 0 : vector<16x8xf32>, vector<16x8xf32>, vector<16x8xf32>, vector<16x8xf32> -> vector<64x8xf32>
    %237 = arith.truncf %236 : vector<64x8xf32> to vector<64x8xbf16>
    %cst_134 = arith.constant dense<0.000000e+00> : vector<64x64xf32>
    %238 = tpu.matmul %225, %231, %cst_134 {dimension_numbers = #tpu.dot_dimension_numbers<[1], [1], [0], [0], [0, 0, 1, 0], [], []>} : vector<64x8xbf16>, vector<64x8xbf16>, vector<64x64xf32> -> vector<64x64xf32>
    %cst_135 = arith.constant 0.353553385 : f32
    %239 = vector.broadcast %cst_135 : f32 to vector<64x64xf32>
    %240 = arith.mulf %238, %239 : vector<64x64xf32>
    %241 = arith.addf %240, %25 : vector<64x64xf32>
    %cst_136 = arith.constant dense<0xFF800000> : vector<64xf32>
    %242 = vector.multi_reduction <maximumf>, %241, %cst_136 [1] : vector<64x64xf32> to vector<64xf32>
    %243 = vector.shape_cast %242 : vector<64xf32> to vector<64x1xf32>
    %244 = vector.broadcast %243 : vector<64x1xf32> to vector<64x64xf32>
    %245 = arith.subf %241, %244 : vector<64x64xf32>
    %246 = math.exp %245 : vector<64x64xf32>
    %cst_137 = arith.constant dense<0.000000e+00> : vector<64xf32>
    %247 = vector.multi_reduction <add>, %246, %cst_137 [1] : vector<64x64xf32> to vector<64xf32>
    %248 = vector.shape_cast %247 : vector<64xf32> to vector<64x1xf32>
    %249 = tpu.reciprocal %248 {approx = true} : vector<64x1xf32> -> vector<64x1xf32>
    %250 = vector.broadcast %249 : vector<64x1xf32> to vector<64x64xf32>
    %251 = arith.mulf %246, %250 : vector<64x64xf32>
    %252 = arith.truncf %251 : vector<64x64xf32> to vector<64x64xbf16>
    %cst_138 = arith.constant dense<0.000000e+00> : vector<64x8xf32>
    %253 = tpu.matmul %252, %237, %cst_138 {dimension_numbers = #tpu.dot_dimension_numbers<[1], [0], [0], [1], [0, 0, 1, 1], [], []>} : vector<64x64xbf16>, vector<64x8xbf16>, vector<64x8xf32> -> vector<64x8xf32>
    %254 = vector.extract_strided_slice %253 {offsets = [0, 0], sizes = [16, 8], strides = [1, 1]} : vector<64x8xf32> to vector<16x8xf32>
    %255 = vector.extract_strided_slice %253 {offsets = [16, 0], sizes = [16, 8], strides = [1, 1]} : vector<64x8xf32> to vector<16x8xf32>
    %256 = vector.extract_strided_slice %253 {offsets = [32, 0], sizes = [16, 8], strides = [1, 1]} : vector<64x8xf32> to vector<16x8xf32>
    %257 = vector.extract_strided_slice %253 {offsets = [48, 0], sizes = [16, 8], strides = [1, 1]} : vector<64x8xf32> to vector<16x8xf32>
    %258 = tpu.concatenate %254, %255, %256, %257 in 1 : vector<16x8xf32>, vector<16x8xf32>, vector<16x8xf32>, vector<16x8xf32> -> vector<16x32xf32>
    %259 = arith.truncf %258 : vector<16x32xf32> to vector<16x32xbf16>
    %cst_139 = arith.constant dense<0.000000e+00> : vector<16x32xf32>
    %260 = tpu.matmul %259, %191, %cst_139 {dimension_numbers = #tpu.dot_dimension_numbers<[1], [0], [0], [1], [0, 0, 1, 1], [], []>} : vector<16x32xbf16>, vector<32x32xbf16>, vector<16x32xf32> -> vector<16x32xf32>
    %261 = vector.broadcast %193 : vector<1x32xf32> to vector<16x32xf32>
    %262 = arith.addf %260, %261 : vector<16x32xf32>
    %263 = arith.addf %177, %262 : vector<16x32xf32>
    %cst_140 = arith.constant dense<0.000000e+00> : vector<16xf32>
    %264 = vector.multi_reduction <add>, %263, %cst_140 [1] : vector<16x32xf32> to vector<16xf32>
    %265 = vector.shape_cast %264 : vector<16xf32> to vector<16x1xf32>
    %cst_141 = arith.constant 3.200000e+01 : f32
    %266 = vector.broadcast %cst_141 : f32 to vector<16x1xf32>
    %267 = arith.divf %265, %266 : vector<16x1xf32>
    %268 = vector.broadcast %267 : vector<16x1xf32> to vector<16x32xf32>
    %269 = arith.subf %263, %268 : vector<16x32xf32>
    %270 = arith.mulf %269, %269 : vector<16x32xf32>
    %cst_142 = arith.constant dense<0.000000e+00> : vector<16xf32>
    %271 = vector.multi_reduction <add>, %270, %cst_142 [1] : vector<16x32xf32> to vector<16xf32>
    %272 = vector.shape_cast %271 : vector<16xf32> to vector<16x1xf32>
    %cst_143 = arith.constant 3.200000e+01 : f32
    %273 = vector.broadcast %cst_143 : f32 to vector<16x1xf32>
    %274 = arith.divf %272, %273 : vector<16x1xf32>
    %cst_144 = arith.constant 9.99999996E-13 : f32
    %275 = vector.broadcast %cst_144 : f32 to vector<16x1xf32>
    %276 = arith.addf %274, %275 : vector<16x1xf32>
    %277 = math.rsqrt %276 : vector<16x1xf32>
    %278 = vector.broadcast %267 : vector<16x1xf32> to vector<16x32xf32>
    %279 = arith.subf %263, %278 : vector<16x32xf32>
    %280 = vector.broadcast %277 : vector<16x1xf32> to vector<16x32xf32>
    %281 = arith.mulf %279, %280 : vector<16x32xf32>
    %282 = vector.broadcast %195 : vector<1x32xf32> to vector<16x32xf32>
    %283 = arith.mulf %281, %282 : vector<16x32xf32>
    %284 = vector.broadcast %197 : vector<1x32xf32> to vector<16x32xf32>
    %285 = arith.addf %283, %284 : vector<16x32xf32>
    %286 = arith.truncf %285 : vector<16x32xf32> to vector<16x32xbf16>
    %cst_145 = arith.constant dense<0.000000e+00> : vector<16x64xf32>
    %287 = tpu.matmul %286, %199, %cst_145 {dimension_numbers = #tpu.dot_dimension_numbers<[1], [0], [0], [1], [0, 0, 1, 1], [], []>} : vector<16x32xbf16>, vector<32x64xbf16>, vector<16x64xf32> -> vector<16x64xf32>
    %288 = vector.broadcast %201 : vector<1x64xf32> to vector<16x64xf32>
    %289 = arith.addf %287, %288 : vector<16x64xf32>
    %cst_146 = arith.constant 5.000000e-01 : f32
    %290 = vector.broadcast %cst_146 : f32 to vector<16x64xf32>
    %291 = arith.mulf %290, %289 : vector<16x64xf32>
    %cst_147 = arith.constant 4.471500e-02 : f32
    %292 = vector.broadcast %cst_147 : f32 to vector<16x64xf32>
    %293 = arith.mulf %292, %289 : vector<16x64xf32>
    %294 = arith.mulf %293, %289 : vector<16x64xf32>
    %295 = arith.mulf %294, %289 : vector<16x64xf32>
    %296 = arith.addf %289, %295 : vector<16x64xf32>
    %cst_148 = arith.constant 0.797884583 : f32
    %297 = vector.broadcast %cst_148 : f32 to vector<16x64xf32>
    %298 = arith.mulf %297, %296 : vector<16x64xf32>
    %299 = math.tanh %298 : vector<16x64xf32>
    %cst_149 = arith.constant 1.000000e+00 : f32
    %300 = vector.broadcast %cst_149 : f32 to vector<16x64xf32>
    %301 = arith.addf %300, %299 : vector<16x64xf32>
    %302 = arith.mulf %291, %301 : vector<16x64xf32>
    %303 = arith.truncf %302 : vector<16x64xf32> to vector<16x64xbf16>
    %cst_150 = arith.constant dense<0.000000e+00> : vector<16x32xf32>
    %304 = tpu.matmul %303, %203, %cst_150 {dimension_numbers = #tpu.dot_dimension_numbers<[1], [0], [0], [1], [0, 0, 1, 1], [], []>} : vector<16x64xbf16>, vector<64x32xbf16>, vector<16x32xf32> -> vector<16x32xf32>
    %305 = vector.broadcast %205 : vector<1x32xf32> to vector<16x32xf32>
    %306 = arith.addf %304, %305 : vector<16x32xf32>
    %307 = arith.addf %285, %306 : vector<16x32xf32>
    %cst_151 = arith.constant dense<0.000000e+00> : vector<16xf32>
    %308 = vector.multi_reduction <add>, %307, %cst_151 [1] : vector<16x32xf32> to vector<16xf32>
    %309 = vector.shape_cast %308 : vector<16xf32> to vector<16x1xf32>
    %cst_152 = arith.constant 3.200000e+01 : f32
    %310 = vector.broadcast %cst_152 : f32 to vector<16x1xf32>
    %311 = arith.divf %309, %310 : vector<16x1xf32>
    %312 = vector.broadcast %311 : vector<16x1xf32> to vector<16x32xf32>
    %313 = arith.subf %307, %312 : vector<16x32xf32>
    %314 = arith.mulf %313, %313 : vector<16x32xf32>
    %cst_153 = arith.constant dense<0.000000e+00> : vector<16xf32>
    %315 = vector.multi_reduction <add>, %314, %cst_153 [1] : vector<16x32xf32> to vector<16xf32>
    %316 = vector.shape_cast %315 : vector<16xf32> to vector<16x1xf32>
    %cst_154 = arith.constant 3.200000e+01 : f32
    %317 = vector.broadcast %cst_154 : f32 to vector<16x1xf32>
    %318 = arith.divf %316, %317 : vector<16x1xf32>
    %cst_155 = arith.constant 9.99999996E-13 : f32
    %319 = vector.broadcast %cst_155 : f32 to vector<16x1xf32>
    %320 = arith.addf %318, %319 : vector<16x1xf32>
    %321 = math.rsqrt %320 : vector<16x1xf32>
    %322 = vector.broadcast %311 : vector<16x1xf32> to vector<16x32xf32>
    %323 = arith.subf %307, %322 : vector<16x32xf32>
    %324 = vector.broadcast %321 : vector<16x1xf32> to vector<16x32xf32>
    %325 = arith.mulf %323, %324 : vector<16x32xf32>
    %326 = vector.broadcast %207 : vector<1x32xf32> to vector<16x32xf32>
    %327 = arith.mulf %325, %326 : vector<16x32xf32>
    %328 = vector.broadcast %209 : vector<1x32xf32> to vector<16x32xf32>
    %329 = arith.addf %327, %328 : vector<16x32xf32>
    %330 = arith.truncf %329 : vector<16x32xf32> to vector<16x32xbf16>
    %c0_156 = arith.constant 0 : index
    %c0_157 = arith.constant 0 : index
    %331 = vector.load %arg20[%c0_156, %c0_157] : memref<32x128xbf16, #tpu.memory_space<vmem>>, vector<32x128xbf16>
    %cst_158 = arith.constant dense<0.000000e+00> : vector<16x128xf32>
    %332 = tpu.matmul %330, %331, %cst_158 {dimension_numbers = #tpu.dot_dimension_numbers<[1], [0], [0], [1], [0, 0, 1, 1], [], []>} : vector<16x32xbf16>, vector<32x128xbf16>, vector<16x128xf32> -> vector<16x128xf32>
    %c0_159 = arith.constant 0 : index
    %c0_160 = arith.constant 0 : index
    %333 = vector.load %arg21[%c0_159, %c0_160] : memref<16x128xf32, #tpu.memory_space<vmem>>, vector<16x128xf32>
    tpu.vector_store %arg21[%c0_159, %c0_160], %332 {strides = array<i32>} : memref<16x128xf32, #tpu.memory_space<vmem>>, vector<16x128xf32>,
    return
  }
}

</mosaic_0001>

<bundles_post_ra>
// kernel: tile.11
= control target key start
LH: loop header
LB: loop body
LE: loop exit
PB: predicated region body
PF: predicated region fallthrough
CT: control target
= control target key end

     0   :  { %s22_s0 = inlined_call_operand.vmem [shape: s32[16], index: 0, kind: input, shape index: {}]   ;;  %s23_s1 = inlined_call_operand.vmem [shape: s32[4,16], index: 1, kind: output, shape index: {}]  }
   0x1   :  { %v4_v0 = vld [vmem:[%s22_s0] ss:$0 sm:$0xff] }
   0x2   :  { %5 = vst [vmem:[%s23_s1] sm:$0xf] %v4_v0 }

// kernel: eq.22
= control target key start
LH: loop header
LB: loop body
LE: loop exit
PB: predicated region body
PF: predicated region fallthrough
CT: control target
= control target key end

     0   :  { %vm7_vm0 = vcmask 130048   ;;  %s37_s8 = smov 16   ;;  %s38_s9 = smov 32   ;;  %vm13_vm1 = vcmask 523648   ;;  %vm19_vm2 = vcmask 392448   ;;  %vm25_vm3 = vcmask 261248   ;;  %s55_s0 = inlined_call_operand.vmem [shape: s32[4,16], index: 0, kind: input, shape index: {}]   ;;  %s56_s1 = inlined_call_operand.vmem [shape: s32[64], index: 1, kind: output, shape index: {}]  }
   0x1   :  { %v4_v0 = vld [vmem:[%s55_s0] sm:$0xf]  ;;  %s36_s0 = smov 48  }
   0x2   :  { %5 = vst [vmem:[#allocation1] sm:$0xf] %v4_v0 }
   0x9   :  { %v10_v1 = vld [vmem:[#allocation1 + $0x3] sm:$0x1]   ;;  %v22_v2 = vld [vmem:[#allocation1 + $0x1] sm:$0x1]   ;;  %v6_v3 = vld [vmem:[#allocation1] sm:$0x1]  }
   0xa   :  { %11 = vrot.lane.b32.xlu0 %v10_v1, %s36_s0  ;;  %23 = vrot.lane.b32.xlu1 %v22_v2, %s37_s8  ;;  %v16_v4 = vld [vmem:[#allocation1 + $0x2] sm:$0x1]   ;;  %8 = vst.msk [vmem:[#allocation0] sm:$0x1] %vm7_vm0, %v6_v3  }
   0xe   :  { %17 = vrot.lane.b32.xlu0 %v16_v4, %s38_s9 }
  0x7c   :  { %v12_v5 = vpop.permute.xlu0 %11   ;;  %v24_v6 = vpop.permute.xlu1 %23  }
  0x7d   :  { %14 = vst.msk [vmem:[#allocation0] sm:$0x1] %vm13_vm1, %v12_v5  }
  0x80   :  { %v18_v7 = vpop.permute.xlu0 %17  }
  0x81   :  { %20 = vst.msk [vmem:[#allocation0] sm:$0x1] %vm19_vm2, %v18_v7  }
  0x82   :  { %26 = vst.msk [vmem:[#allocation0] sm:$0x1] %vm25_vm3, %v24_v6  }
  0x89   :  { %v30_v8 = vld [vmem:[#allocation0] sm:$0x1] }
  0x8a   :  { %32 = vst [vmem:[%s56_s1] sm:$0x1] %v30_v8 }

// kernel: bert_select_forward.1
= control target key start
LH: loop header
LB: loop body
LE: loop exit
PB: predicated region body
PF: predicated region fallthrough
CT: control target
= control target key end

     0   :  { %vm73_vm0 = vcmask 261120   ;;  %v2644_v15 = vmov 0.0   ;;  %vm2645_vm1 = vmmov 0   ;;  %vm416_vm2 = vcmask 64512   ;;  %s2647_s27 = smov 120   ;;  %s2648_s29 = smov 104   ;;  %s3237_s0 = inlined_call_operand.vmem [shape: f32[16,32], index: 0, kind: input, shape index: {}]   ;;  %s3238_s4 = inlined_call_operand.vmem [shape: bf16[2,32,32], index: 4, kind: input, shape index: {}]   ;;  %s3239_s6 = inlined_call_operand.vmem [shape: bf16[2,32,32], index: 6, kind: input, shape index: {}]   ;;  %s3240_s8 = inlined_call_operand.vmem [shape: bf16[2,32,32], index: 8, kind: input, shape index: {}]   ;;  %s3241_s2 = inlined_call_operand.vmem [shape: f32[1,32], index: 2, kind: input, shape index: {}]   ;;  %s3242_s3 = inlined_call_operand.vmem [shape: f32[1,32], index: 3, kind: input, shape index: {}]   ;;  %s3243_s5 = inlined_call_operand.vmem [shape: f32[2,1,32], index: 5, kind: input, shape index: {}]   ;;  %s3244_s7 = inlined_call_operand.vmem [shape: f32[2,1,32], index: 7, kind: input, shape index: {}]   ;;  %s3245_s9 = inlined_call_operand.vmem [shape: f32[2,1,32], index: 9, kind: input, shape index: {}]   ;;  %s3246_s1 = inlined_call_operand.vmem [shape: f32[64,64], index: 1, kind: input, shape index: {}]   ;;  %s3247_s10 = inlined_call_operand.vmem [shape: bf16[2,32,32], index: 10, kind: input, shape index: {}]   ;;  %s3248_s11 = inlined_call_operand.vmem [shape: f32[2,1,32], index: 11, kind: input, shape index: {}]   ;;  %s3249_s14 = inlined_call_operand.vmem [shape: bf16[2,32,64], index: 14, kind: input, shape index: {}]   ;;  %s3250_s12 = inlined_call_operand.vmem [shape: f32[2,1,32], index: 12, kind: input, shape index: {}]   ;;  %s3251_s13 = inlined_call_operand.vmem [shape: f32[2,1,32], index: 13, kind: input, shape index: {}]   ;;  %s3252_s16 = inlined_call_operand.vmem [shape: bf16[2,64,32], index: 16, kind: input, shape index: {}]   ;;  %s3253_s15 = inlined_call_operand.vmem [shape: f32[2,1,64], index: 15, kind: input, shape index: {}]   ;;  %s3254_s17 = inlined_call_operand.vmem [shape: f32[2,1,32], index: 17, kind: input, shape index: {}]   ;;  %s3255_s18 = inlined_call_operand.vmem [shape: f32[2,1,32], index: 18, kind: input, shape index: {}]   ;;  %s3256_s19 = inlined_call_operand.vmem [shape: f32[2,1,32], index: 19, kind: input, shape index: {}]   ;;  %s3257_s20 = inlined_call_operand.vmem [shape: bf16[32,128], index: 20, kind: input, shape index: {}]   ;;  %s3258_s21 = inlined_call_operand.vmem [shape: f32[16,128], index: 21, kind: output, shape index: {}]  }
   0x1   :  { %3264 = sst [smem:[#allocation2_spill]] %s3237_s0  ;;  %2210 = vmatprep.subr.bf16.mxu0 %v2644_v15  ;;  %2218 = vmatprep.subr.bf16.mxu1 %v2644_v15  ;;  %v2018_v38 = vld [vmem:[%s3243_s5] ss:$0 sm:$0xff]  ;;  %vm522_vm3 = vcmask 523264   ;;  %s2649_s22 = smov 8   ;;  %vm718_vm4 = vcmask 130048  }
   0x2   :  { %3265 = sst [smem:[#allocation3_spill]] %s3238_s4  ;;  %s3270_s26 = sld [smem:[#allocation2_spill]]  ;;  %2214 = vmatprep.mubr.msk.bf16.mxu0 %vm2645_vm1, %v2644_v15  ;;  %2222 = vmatprep.mubr.msk.bf16.mxu1 %vm2645_vm1, %v2644_v15  ;;  %v2022_v40 = vld [vmem:[%s3244_s7] ss:$0 sm:$0xff]  ;;  %vm721_vm5 = vcmask 195584  }
   0x3   :  { %3266 = sst [smem:[#allocation4_spill]] %s3239_s6  ;;  %s3271_s0 = sld [smem:[#allocation3_spill]]  ;;  %v2026_v57 = vld [vmem:[%s3245_s9] ss:$0 sm:$0xff] }
   0x4   :  { %3267 = sst [smem:[#allocation5_spill]] %s3240_s8  ;;  %s2650_s23 = smov 24  }
   0x5   :  { %3268 = sst [smem:[#allocation6_spill]] %s3241_s2  ;;  %s3275_s30 = sld [smem:[#allocation5_spill]] }
   0x6   :  { %3269 = sst [smem:[#allocation7_spill]] %s3242_s3  ;;  %s3272_s3 = sld [smem:[#allocation4_spill]] }
   0x7   :  { %s3274_s28 = sld [smem:[#allocation7_spill]]  ;;  %s3263_s4 = smov 16  }
   0x8   :  { %v69_v0 = vld [vmem:[%s3270_s26] sm:$0xff]  ;;  %v70_v1 = vld [vmem:[%s3270_s26 + $0x8] sm:$0xff]  ;;  %s3273_s26 = sld [smem:[#allocation6_spill]] }
   0x9   :  { %v74_v2 = vsel %vm73_vm0, %v69_v0, 0.0  ;;  %v77_v3 = vsel %vm73_vm0, %v70_v1, 0.0  ;;  %v2522_v14 = vld [vmem:[%s3271_s0] sm:$0xff]   ;;  %v2524_v17 = vld [vmem:[%s3271_s0 + $0x8] sm:$0xff]  }
   0xa   :  { %75 = vadd.xlane.f32.xlu0 %v74_v2  ;;  %2211 = vmatpush3.bf16.msra.mxu0 %v2522_v14 }
   0xb   :  { %2212 = vmatprep.subr.bf16.mxu0 %v2644_v15  ;;  %v2526_v35 = vld [vmem:[%s3275_s30] sm:$0xff]   ;;  %v2527_v37 = vld [vmem:[%s3275_s30 + $0x8] sm:$0xff]  }
   0xc   :  { %v2523_v16 = vld [vmem:[%s3272_s3] sm:$0xff]   ;;  %v2525_v18 = vld [vmem:[%s3272_s3 + $0x8] sm:$0xff]  }
   0xd   :  { %2219 = vmatpush3.bf16.msra.mxu1 %v2523_v16  ;;  %v2017_v31 = vld [vmem:[%s3274_s28] ss:$0 sm:$0xff] }
   0xe   :  { %78 = vadd.xlane.f32.xlu0 %v77_v3  ;;  %2220 = vmatprep.subr.bf16.mxu1 %v2644_v15  ;;  %v2016_v27 = vld [vmem:[%s3273_s26] ss:$0 sm:$0xff]  ;;  %s2646_s26 = smov 112  }
   0xf   :  { %2213 = vmatpush3.bf16.msra.mxu0 %v2524_v17 }
  0x10   :  { %2226 = vmatprep.subr.bf16.mxu0 %v2644_v15 }
  0x11   :  { %2221 = vmatpush3.bf16.msra.mxu1 %v2525_v18 }
  0x97   :  { %v76_v4 = vpop.xlane.xlu0 %75 }
  0x98   :  { %v81_v5 = vmul.f32 0.03125, %v76_v4 }
  0x9a   :  { %v83_v6 = vsub.f32 %v69_v0, %v81_v5 }
  0x9b   :  { %v79_v7 = vpop.xlane.xlu0 %78 }
  0x9c   :  { %v82_v8 = vmul.f32 0.03125, %v79_v7  ;;  %v85_v9 = vmul.f32 %v83_v6, %v83_v6 }
  0x9e   :  { %v84_v10 = vsub.f32 %v70_v1, %v82_v8  ;;  %v87_v11 = vsel %vm73_vm0, %v85_v9, 0.0 }
  0x9f   :  { %88 = vadd.xlane.f32.xlu1 %v87_v11 }
  0xa0   :  { %v86_v12 = vmul.f32 %v84_v10, %v84_v10 }
  0xa2   :  { %v90_v13 = vsel %vm73_vm0, %v86_v12, 0.0 }
  0xa3   :  { %91 = vadd.xlane.f32.xlu1 %v90_v13 }
 0x12c   :  { %v89_v19 = vpop.xlane.xlu1 %88 }
 0x12d   :  { %v93_v20 = vmul.f32 0.03125, %v89_v19 }
 0x12f   :  { %v95_v21 = vadd.f32 1e-12, %v93_v20 }
 0x130   :  { %v92_v22 = vpop.xlane.xlu1 %91 }
 0x131   :  { %2552 = vrsqrt.f32 %v95_v21  ;;  %v94_v23 = vmul.f32 0.03125, %v92_v22 }
 0x133   :  { %v96_v24 = vadd.f32 1e-12, %v94_v23 }
 0x135   :  { %2554 = vrsqrt.f32 %v96_v24 }
 0x13b   :  { %v2553_v25 = vpop.eup %2552 }
 0x13c   :  { %v99_v26 = vmul.f32 %v2553_v25, %v83_v6 }
 0x13e   :  { %v107_v30 = vmul.f32 %v2016_v27, %v99_v26 }
 0x13f   :  { %v2555_v28 = vpop.eup %2554 }
 0x140   :  { %v100_v29 = vmul.f32 %v2555_v28, %v84_v10  ;;  %v2799_v33 = vadd.f32 %v2017_v31, %v107_v30 }
 0x142   :  { %v108_v32 = vmul.f32 %v2016_v27, %v100_v29 }
 0x144   :  { %v2801_v34 = vadd.f32 %v2017_v31, %v108_v32  ;;  %v2852_v32 = vld [vmem:[%s3246_s1] sm:$0xff] }
 0x146   :  { %v163_v36 = vpack.c.bf16 %v2801_v34, %v2799_v33 }
 0x148   :  { %2215 = vmatmul.mubr.msk.bf16.vlgmr.msra.gmra.mrb[0].mxu0 %vm73_vm0, %v163_v36  ;;  %2223 = vmatmul.mubr.msk.bf16.vlgmr.msra.gmra.mrb[0].mxu1 %vm73_vm0, %v163_v36 }
 0x149   :  { %2227 = vmatpush3.bf16.msra.mxu0 %v2526_v35  ;;  %2230 = vmatprep.mubr.msk.bf16.mxu0 %vm2645_vm1, %v2644_v15 }
 0x14a   :  { %2228 = vmatprep.subr.bf16.mxu0 %v2644_v15 }
 0x14d   :  { %2229 = vmatpush3.bf16.msra.mxu0 %v2527_v37 }
 0x150   :  { %2231 = vmatmul.mubr.msk.bf16.vlgmr.msra.gmra.mrb[4].mxu0 %vm73_vm0, %v163_v36 }
 0x21b   :  { %v219_v39 = vpop.f32.mrb[0].mxu0  ;;  %v278_v41 = vpop.f32.mrb[0].mxu1 }
 0x21c   :  { %v2216_v42 = vpop.f32.mrb[1].mxu0  ;;  %v2224_v43 = vpop.f32.mrb[1].mxu1  ;;  %v220_v46 = vadd.f32 %v2018_v38, %v219_v39  ;;  %v279_v47 = vadd.f32 %v2022_v40, %v278_v41  ;;  %v2857_v39 = vld [vmem:[%s3246_s1 + $0x8] sm:$0xff] }
 0x21d   :  { %v222_v44 = vpop.f32.mrb[2].mxu0  ;;  %v281_v45 = vpop.f32.mrb[2].mxu1 }
 0x21e   :  { %v223_v48 = vadd.f32 %v2018_v38, %v222_v44  ;;  %v282_v49 = vadd.f32 %v2022_v40, %v281_v45  ;;  %v2217_v50 = vpop.f32.mrb[3].mxu0  ;;  %v2225_v51 = vpop.f32.mrb[3].mxu1  ;;  %v2862_v40 = vld [vmem:[%s3246_s1 + $0x10] sm:$0xff] }
 0x220   :  { %v2407_v52 = vpack.i.bf16 %v282_v49, %v279_v47  ;;  %v388_v53 = vpack.c.bf16 %v282_v49, %v279_v47  ;;  %v364_v54 = vpack.c.bf16 %v223_v48, %v220_v46  ;;  %v2422_v55 = vpack.i.bf16 %v223_v48, %v220_v46  ;;  %v2871_v47 = vld [vmem:[%s3246_s1 + $0x18] sm:$0xff] }
 0x222   :  { %2408 = vrot.lane.b32.xlu1 %v2407_v52, %s2646_s26  ;;  %2403 = vrot.lane.b32.xlu0 %v2407_v52, %s2647_s27  ;;  %v430_v56 = vsel %vm416_vm2, %v388_v53, 0 }
 0x223   :  { %2386 = vmatprep.subr.msk.bf16.mxu1 %vm416_vm2, %v388_v53  ;;  %2242 = vmatprep.mubr.msk.bf16.mxu1 %vm416_vm2, %v364_v54  ;;  %v337_v58 = vpop.f32.mrb[4].mxu0 }
 0x224   :  { %2235 = vmatpush3.bf16.xpose.msra.mxu1 %v430_v56  ;;  %v2232_v59 = vpop.f32.mrb[5].mxu0  ;;  %v338_v61 = vadd.f32 %v2026_v57, %v337_v58  ;;  %v2879_v56 = vld [vmem:[%s3246_s1 + $0x28] sm:$0xff] }
 0x225   :  { %v340_v60 = vpop.f32.mrb[6].mxu0 }
 0x226   :  { %v341_v62 = vadd.f32 %v2026_v57, %v340_v60  ;;  %2413 = vrot.lane.b32.xlu1 %v2407_v52, %s2648_s29  ;;  %2423 = vrot.lane.b32.xlu0 %v2422_v55, %s2646_s26  ;;  %v2233_v63 = vpop.f32.mrb[7].mxu0  ;;  %v2884_v57 = vld [vmem:[%s3246_s1 + $0x20] sm:$0xff]  ;;  %v2889_v60 = vld [vmem:[%s3246_s1 + $0x38] sm:$0xff] }
 0x228   :  { %v412_v0 = vpack.c.bf16 %v341_v62, %v338_v61  ;;  %v2833_v1 = vpack.i.bf16 %v341_v62, %v338_v61 }
 0x22a   :  { %2418 = vrot.lane.b32.xlu1 %v2422_v55, %s2647_s27  ;;  %2250 = vmatprep.subr.bf16.mxu0 %v412_v0 }
 0x22b   :  { %2251 = vmatpush3.bf16.msra.mxu0 %v412_v0 }
 0x22e   :  { %2428 = vrot.lane.b32.xlu1 %v2422_v55, %s2648_s29 }
 0x294   :  { %v2409_v2 = vpop.permute.xlu1 %2408  ;;  %v2404_v3 = vpop.permute.xlu0 %2403 }
 0x295   :  { %v2406_v4 = vunpack.i.h.bf16 %v2404_v3  ;;  %v2405_v5 = vunpack.i.l.bf16 %v2404_v3  ;;  %v2411_v6 = vunpack.i.h.bf16 %v2409_v2  ;;  %v2410_v7 = vunpack.i.l.bf16 %v2409_v2  ;;  %v2899_v2 = vld [vmem:[%s3246_s1 + $0x30] sm:$0xff] }
 0x297   :  { %v389_v8 = vpack.c.bf16 %v2406_v4, %v2405_v5  ;;  %v390_v9 = vpack.c.bf16 %v2411_v6, %v2410_v7 }
 0x298   :  { %v2414_v11 = vpop.permute.xlu1 %2413  ;;  %v2424_v18 = vpop.permute.xlu0 %2423 }
 0x299   :  { %2387 = vmatprep.subr.msk.bf16.mxu1 %vm416_vm2, %v389_v8  ;;  %v433_v10 = vsel %vm416_vm2, %v389_v8, 0  ;;  %v2416_v12 = vunpack.i.h.bf16 %v2414_v11  ;;  %v2415_v13 = vunpack.i.l.bf16 %v2414_v11  ;;  %v436_v16 = vsel %vm416_vm2, %v390_v9, 0 }
 0x29a   :  { %2237 = vmatpush3.bf16.xpose.msra.mxu1 %v433_v10  ;;  %v2426_v22 = vunpack.i.h.bf16 %v2424_v18  ;;  %v2425_v23 = vunpack.i.l.bf16 %v2424_v18 }
 0x29b   :  { %2388 = vmatprep.subr.msk.bf16.mxu1 %vm416_vm2, %v390_v9  ;;  %v391_v14 = vpack.c.bf16 %v2416_v12, %v2415_v13 }
 0x29c   :  { %v2419_v17 = vpop.permute.xlu1 %2418  ;;  %v366_v25 = vpack.c.bf16 %v2426_v22, %v2425_v23 }
 0x29d   :  { %v439_v19 = vsel %vm416_vm2, %v391_v14, 0  ;;  %v2421_v20 = vunpack.i.h.bf16 %v2419_v17  ;;  %v2420_v21 = vunpack.i.l.bf16 %v2419_v17 }
 0x29f   :  { %v365_v24 = vpack.c.bf16 %v2421_v20, %v2420_v21 }
 0x2a0   :  { %v2429_v26 = vpop.permute.xlu1 %2428 }
 0x2a1   :  { %v2431_v27 = vunpack.i.h.bf16 %v2429_v26  ;;  %v2430_v28 = vunpack.i.l.bf16 %v2429_v26 }
 0x2a2   :  { %2239 = vmatpush3.bf16.xpose.msra.mxu1 %v436_v16 }
 0x2a3   :  { %2389 = vmatprep.subr.msk.bf16.mxu1 %vm416_vm2, %v391_v14  ;;  %v367_v29 = vpack.c.bf16 %v2431_v27, %v2430_v28 }
 0x2aa   :  { %2241 = vmatpush3.bf16.xpose.msra.mxu1 %v439_v19 }
 0x2ab   :  { %2282 = vmatprep.subr.bf16.mxu1 %v2644_v15 }
 0x2b1   :  { %2243 = vmatmul.mubr.msk.bf16.vlgmr.msra.gmra.mrb[4].mxu1 %vm416_vm2, %v365_v24 }
 0x2b2   :  { %2246 = vmatprep.mubr.msk.bf16.mxu1 %vm416_vm2, %v366_v25 }
 0x2b9   :  { %2247 = vmatmul.mubr.msk.bf16.gmra.mrb[8].mxu1 %vm416_vm2, %v367_v29 }
 0x2ba   :  { %2290 = vmatprep.mubr.msk.bf16.mxu1 %vm2645_vm1, %v2644_v15 }
 0x384   :  { %v2244_v30 = vpop.f32.mrb[4].mxu1 }
 0x385   :  { %v475_v31 = vpop.f32.mrb[5].mxu1  ;;  %v508_v35 = vmul.f32 0.35355338, %v2244_v30 }
 0x386   :  { %v506_v36 = vmul.f32 0.35355338, %v475_v31  ;;  %v2245_v37 = vpop.f32.mrb[6].mxu1 }
 0x387   :  { %v478_v38 = vpop.f32.mrb[7].mxu1  ;;  %v509_v43 = vmul.f32 0.35355338, %v2245_v37  ;;  %v516_v46 = vadd.f32 %v508_v35, %v2862_v40 }
 0x388   :  { %v507_v41 = vmul.f32 0.35355338, %v478_v38  ;;  %v514_v42 = vadd.f32 %v506_v36, %v2852_v32 }
 0x389   :  { %v529_v53 = vsel %vm522_vm3, %v516_v46, -inf  ;;  %v517_v54 = vadd.f32 %v509_v43, %v2871_v47 }
 0x38a   :  { %v523_v44 = vsel %vm522_vm3, %v514_v42, -inf  ;;  %v515_v45 = vadd.f32 %v507_v41, %v2857_v39 }
 0x38b   :  { %524 = vmax.xlane.f32.xlu0 %v523_v44  ;;  %v532_v62 = vsel %vm522_vm3, %v517_v54, -inf }
 0x38c   :  { %v2248_v48 = vpop.f32.mrb[8].mxu1  ;;  %v526_v49 = vsel %vm522_vm3, %v515_v45, -inf }
 0x38d   :  { %527 = vmax.xlane.f32.xlu1 %v526_v49  ;;  %v491_v50 = vpop.f32.mrb[9].mxu1  ;;  %v512_v61 = vmul.f32 0.35355338, %v2248_v48 }
 0x38e   :  { %v510_v51 = vmul.f32 0.35355338, %v491_v50  ;;  %v2249_v52 = vpop.f32.mrb[10].mxu1 }
 0x38f   :  { %530 = vmax.xlane.f32.xlu0 %v529_v53  ;;  %v494_v55 = vpop.f32.mrb[11].mxu1  ;;  %v513_v58 = vmul.f32 0.35355338, %v2249_v52  ;;  %v520_v6 = vadd.f32 %v512_v61, %v2899_v2 }
 0x390   :  { %v511_v59 = vmul.f32 0.35355338, %v494_v55  ;;  %v518_v0 = vadd.f32 %v510_v51, %v2884_v57 }
 0x391   :  { %v521_v4 = vadd.f32 %v513_v58, %v2889_v60  ;;  %v541_v8 = vsel %vm522_vm3, %v520_v6, -inf }
 0x392   :  { %v2893_v63 = vadd.f32 %v511_v59, %v2879_v56  ;;  %v535_v5 = vsel %vm522_vm3, %v518_v0, -inf }
 0x393   :  { %533 = vmax.xlane.f32.xlu0 %v532_v62  ;;  %v544_v7 = vsel %vm522_vm3, %v521_v4, -inf }
 0x394   :  { %v538_v3 = vsel %vm522_vm3, %v2893_v63, -inf }
 0x395   :  { %539 = vmax.xlane.f32.xlu1 %v538_v3 }
 0x397   :  { %536 = vmax.xlane.f32.xlu0 %v535_v5 }
 0x399   :  { %545 = vmax.xlane.f32.xlu1 %v544_v7 }
 0x39b   :  { %542 = vmax.xlane.f32.xlu0 %v541_v8 }
 0x418   :  { %v525_v9 = vpop.xlane.xlu0 %524 }
 0x419   :  { %v547_v10 = vsub.f32 %v514_v42, %v525_v9 }
 0x41a   :  { %v528_v11 = vpop.xlane.xlu1 %527 }
 0x41b   :  { %v555_v14 = vmul.f32 1.442695, %v547_v10  ;;  %v548_v16 = vsub.f32 %v515_v45, %v528_v11 }
 0x41c   :  { %v531_v12 = vpop.xlane.xlu0 %530 }
 0x41d   :  { %v549_v13 = vsub.f32 %v516_v46, %v531_v12  ;;  %v557_v20 = vmul.f32 1.442695, %v548_v16 }
 0x41f   :  { %v559_v17 = vmul.f32 1.442695, %v549_v13 }
 0x420   :  { %v534_v18 = vpop.xlane.xlu0 %533 }
 0x421   :  { %2556 = vpow2.f32 %v559_v17  ;;  %v550_v19 = vsub.f32 %v517_v54, %v534_v18 }
 0x422   :  { %2558 = vpow2.f32 %v555_v14  ;;  %v540_v45 = vpop.xlane.xlu1 %539 }
 0x423   :  { %v561_v21 = vmul.f32 1.442695, %v550_v19  ;;  %v552_v49 = vsub.f32 %v2893_v63, %v540_v45 }
 0x424   :  { %v537_v22 = vpop.xlane.xlu0 %536 }
 0x425   :  { %2560 = vpow2.f32 %v561_v21  ;;  %v551_v23 = vsub.f32 %v518_v0, %v537_v22  ;;  %v565_v51 = vmul.f32 1.442695, %v552_v49 }
 0x426   :  { %2562 = vpow2.f32 %v557_v20  ;;  %v546_v46 = vpop.xlane.xlu1 %545 }
 0x427   :  { %v563_v27 = vmul.f32 1.442695, %v551_v23  ;;  %v554_v48 = vsub.f32 %v521_v4, %v546_v46 }
 0x428   :  { %v543_v24 = vpop.xlane.xlu0 %542 }
 0x429   :  { %v553_v25 = vsub.f32 %v520_v6, %v543_v24  ;;  %v569_v50 = vmul.f32 1.442695, %v554_v48 }
 0x42b   :  { %v2908_v26 = vpop.eup %2556  ;;  %v567_v28 = vmul.f32 1.442695, %v553_v25 }
 0x42c   :  { %v577_v29 = vsel %vm522_vm3, %v2908_v26, 0.0  ;;  %v2559_v30 = vpop.eup %2558 }
 0x42d   :  { %2564 = vpow2.f32 %v567_v28  ;;  %578 = vadd.xlane.f32.xlu0 %v577_v29  ;;  %v571_v35 = vsel %vm522_vm3, %v2559_v30, 0.0 }
 0x42e   :  { %2566 = vpow2.f32 %v563_v27 }
 0x42f   :  { %v2912_v31 = vpop.eup %2560  ;;  %2568 = vpow2.f32 %v569_v50 }
 0x430   :  { %v580_v36 = vsel %vm522_vm3, %v2912_v31, 0.0  ;;  %v2563_v37 = vpop.eup %2562  ;;  %2570 = vpow2.f32 %v565_v51 }
 0x431   :  { %572 = vadd.xlane.f32.xlu0 %v571_v35  ;;  %581 = vadd.xlane.f32.xlu1 %v580_v36  ;;  %v574_v38 = vsel %vm522_vm3, %v2563_v37, 0.0 }
 0x435   :  { %575 = vadd.xlane.f32.xlu1 %v574_v38 }
 0x437   :  { %v2918_v41 = vpop.eup %2564 }
 0x438   :  { %v589_v42 = vsel %vm522_vm3, %v2918_v41, 0.0  ;;  %v2922_v43 = vpop.eup %2566 }
 0x439   :  { %590 = vadd.xlane.f32.xlu0 %v589_v42  ;;  %v583_v44 = vsel %vm522_vm3, %v2922_v43, 0.0  ;;  %v2569_v52 = vpop.eup %2568 }
 0x43a   :  { %v592_v53 = vsel %vm522_vm3, %v2569_v52, 0.0  ;;  %v2571_v54 = vpop.eup %2570 }
 0x43b   :  { %v586_v55 = vsel %vm522_vm3, %v2571_v54, 0.0 }
 0x43d   :  { %584 = vadd.xlane.f32.xlu0 %v583_v44  ;;  %v2529_v44 = vld [vmem:[%s3247_s10 + $0x8] sm:$0xff]  }
 0x446   :  { %2438 = vrot.lane.b32.xlu1 %v2833_v1, %s2646_s26 }
 0x453   :  { %2433 = vrot.lane.b32.xlu0 %v2833_v1, %s2647_s27 }
 0x46a   :  { %593 = vadd.xlane.f32.xlu1 %v592_v53 }
 0x46e   :  { %587 = vadd.xlane.f32.xlu1 %v586_v55 }
 0x47f   :  { %2443 = vrot.lane.b32.xlu1 %v2833_v1, %s2648_s29 }
 0x4ba   :  { %v579_v58 = vpop.xlane.xlu0 %578 }
 0x4be   :  { %v573_v59 = vpop.xlane.xlu0 %572  ;;  %v582_v61 = vpop.xlane.xlu1 %581 }
 0x4bf   :  { %2572 = vrcp.f32 %v573_v59 }
 0x4c2   :  { %v576_v62 = vpop.xlane.xlu1 %575 }
 0x4c3   :  { %2574 = vrcp.f32 %v576_v62 }
 0x4c4   :  { %2576 = vrcp.f32 %v582_v61 }
 0x4c5   :  { %2578 = vrcp.f32 %v579_v58 }
 0x4c6   :  { %v591_v63 = vpop.xlane.xlu0 %590  ;;  %v2439_v4 = vpop.permute.xlu1 %2438 }
 0x4c7   :  { %v2441_v9 = vunpack.i.h.bf16 %v2439_v4  ;;  %v2440_v10 = vunpack.i.l.bf16 %v2439_v4 }
 0x4c9   :  { %v2573_v3 = vpop.eup %2572  ;;  %v414_v14 = vpack.c.bf16 %v2441_v9, %v2440_v10 }
 0x4ca   :  { %v585_v0 = vpop.xlane.xlu0 %584  ;;  %v603_v7 = vmul.f32 %v2573_v3, %v2559_v30 }
 0x4cb   :  { %2580 = vrcp.f32 %v585_v0 }
 0x4cd   :  { %v2575_v5 = vpop.eup %2574 }
 0x4ce   :  { %v2434_v6 = vpop.permute.xlu0 %2433  ;;  %v604_v8 = vmul.f32 %v2575_v5, %v2563_v37  ;;  %v2577_v18 = vpop.eup %2576 }
 0x4cf   :  { %v2436_v11 = vunpack.i.h.bf16 %v2434_v6  ;;  %v2435_v12 = vunpack.i.l.bf16 %v2434_v6  ;;  %v2579_v22 = vpop.eup %2578  ;;  %v606_v23 = vmul.f32 %v2577_v18, %v2912_v31 }
 0x4d0   :  { %v611_v13 = vpack.c.bf16 %v604_v8, %v603_v7  ;;  %v605_v27 = vmul.f32 %v2579_v22, %v2908_v26 }
 0x4d1   :  { %v413_v1 = vpack.c.bf16 %v2436_v11, %v2435_v12 }
 0x4d2   :  { %2258 = vmatprep.mubr.msk.bf16.mxu0 %vm522_vm3, %v611_v13  ;;  %v612_v29 = vpack.c.bf16 %v606_v23, %v605_v27  ;;  %v2038_v13 = vld [vmem:[%s3248_s11] ss:$0 sm:$0xff] }
 0x4d3   :  { %2252 = vmatprep.subr.bf16.mxu0 %v413_v1 }
 0x4d4   :  { %2253 = vmatpush3.bf16.msra.mxu0 %v413_v1 }
 0x4d5   :  { %2254 = vmatprep.subr.bf16.mxu0 %v414_v14  ;;  %v2581_v25 = vpop.eup %2580 }
 0x4d6   :  { %v607_v35 = vmul.f32 %v2581_v25, %v2922_v43  ;;  %v2528_v43 = vld [vmem:[%s3247_s10] sm:$0xff]  }
 0x4d8   :  { %2255 = vmatpush3.bf16.msra.mxu0 %v414_v14 }
 0x4f7   :  { %v594_v16 = vpop.xlane.xlu1 %593 }
 0x4fb   :  { %v588_v17 = vpop.xlane.xlu1 %587 }
 0x4fc   :  { %2582 = vrcp.f32 %v588_v17 }
 0x4fd   :  { %2584 = vrcp.f32 %v594_v16 }
 0x4fe   :  { %2586 = vrcp.f32 %v591_v63 }
 0x4ff   :  { %v2444_v19 = vpop.permute.xlu1 %2443 }
 0x500   :  { %v2446_v20 = vunpack.i.h.bf16 %v2444_v19  ;;  %v2445_v21 = vunpack.i.l.bf16 %v2444_v19 }
 0x502   :  { %v415_v24 = vpack.c.bf16 %v2446_v20, %v2445_v21 }
 0x504   :  { %2256 = vmatprep.subr.bf16.mxu0 %v415_v24 }
 0x505   :  { %2257 = vmatpush3.bf16.msra.mxu0 %v415_v24 }
 0x506   :  { %v2583_v28 = vpop.eup %2582  ;;  %2266 = vmatprep.subr.bf16.mxu0 %v2644_v15 }
 0x507   :  { %v2585_v30 = vpop.eup %2584  ;;  %v608_v36 = vmul.f32 %v2583_v28, %v2571_v54 }
 0x508   :  { %2259 = vmatmul.mubr.msk.bf16.vlgmr.msra.gmra.mrb[8].mxu0 %vm522_vm3, %v612_v29  ;;  %v2587_v37 = vpop.eup %2586  ;;  %v610_v42 = vmul.f32 %v2585_v30, %v2569_v52 }
 0x509   :  { %v613_v38 = vpack.c.bf16 %v608_v36, %v607_v35  ;;  %v609_v31 = vmul.f32 %v2587_v37, %v2918_v41  ;;  %2267 = vmatpush3.bf16.msra.mxu0 %v2528_v43 }
 0x50a   :  { %2268 = vmatprep.subr.bf16.mxu0 %v2644_v15 }
 0x50b   :  { %2262 = vmatprep.mubr.msk.bf16.mxu0 %vm522_vm3, %v613_v38  ;;  %v614_v26 = vpack.c.bf16 %v610_v42, %v609_v31  ;;  %v2531_v38 = vld [vmem:[%s3249_s14 + $0x8] sm:$0xff]  }
 0x50d   :  { %2269 = vmatpush3.bf16.msra.mxu0 %v2529_v44 }
 0x50e   :  { %2274 = vmatprep.subr.bf16.mxu0 %v2644_v15 }
 0x510   :  { %2263 = vmatmul.mubr.msk.bf16.gmra.mrb[12].mxu0 %vm522_vm3, %v614_v26 }
 0x511   :  { %2270 = vmatprep.mubr.msk.bf16.mxu0 %vm2645_vm1, %v2644_v15 }
 0x5db   :  { %v2260_v41 = vpop.f32.mrb[8].mxu0 }
 0x5dc   :  { %v661_v45 = vpop.f32.mrb[9].mxu0 }
 0x5dd   :  { %v2261_v46 = vpop.f32.mrb[10].mxu0 }
 0x5de   :  { %v2447_v48 = vpack.i.bf16 %v2261_v46, %v2260_v41  ;;  %v664_v49 = vpop.f32.mrb[11].mxu0 }
 0x5e0   :  { %2448 = vrot.lane.b32.xlu1 %v2447_v48, %s2649_s22  ;;  %v2042_v48 = vld [vmem:[%s3250_s12] ss:$0 sm:$0xff] }
 0x5e3   :  { %v2264_v50 = vpop.f32.mrb[12].mxu0 }
 0x5e4   :  { %v677_v51 = vpop.f32.mrb[13].mxu0 }
 0x5e5   :  { %v2265_v52 = vpop.f32.mrb[14].mxu0 }
 0x5e6   :  { %v2457_v53 = vpack.i.bf16 %v2265_v52, %v2264_v50  ;;  %v680_v54 = vpop.f32.mrb[15].mxu0  ;;  %v2043_v52 = vld [vmem:[%s3251_s13] ss:$0 sm:$0xff] }
 0x5e7   :  { %v2452_v55 = vpack.i.bf16 %v680_v54, %v677_v51 }
 0x5e8   :  { %2458 = vrot.lane.b32.xlu1 %v2457_v53, %s2650_s23 }
 0x5e9   :  { %2453 = vrot.lane.b32.xlu0 %v2452_v55, %s3263_s4 }
 0x652   :  { %v2449_v58 = vpop.permute.xlu1 %2448 }
 0x653   :  { %v2451_v59 = vunpack.i.h.bf16 %v2449_v58  ;;  %v2450_v61 = vunpack.i.l.bf16 %v2449_v58 }
 0x655   :  { %v716_v4 = vsel %vm416_vm2, %v661_v45, %v2450_v61  ;;  %v717_v5 = vsel %vm416_vm2, %v664_v49, %v2451_v59  ;;  %v2532_v59 = vld [vmem:[%s3252_s16] sm:$0xff]   ;;  %v2533_v61 = vld [vmem:[%s3252_s16 + $0x8] sm:$0xff]  }
 0x656   :  { %2283 = vmatpush3.bf16.msra.mxu1 %v2532_v59 }
 0x657   :  { %2284 = vmatprep.subr.bf16.mxu1 %v2644_v15 }
 0x65a   :  { %v2459_v62 = vpop.permute.xlu1 %2458  ;;  %2285 = vmatpush3.bf16.msra.mxu1 %v2533_v61 }
 0x65b   :  { %v2454_v63 = vpop.permute.xlu0 %2453  ;;  %v2461_v6 = vunpack.i.h.bf16 %v2459_v62  ;;  %v2460_v7 = vunpack.i.l.bf16 %v2459_v62  ;;  %2286 = vmatprep.subr.bf16.mxu1 %v2644_v15  ;;  %v2534_v62 = vld [vmem:[%s3252_s16 + $0x10] sm:$0xff]  }
 0x65c   :  { %v2456_v0 = vunpack.i.h.bf16 %v2454_v63  ;;  %v2455_v3 = vunpack.i.l.bf16 %v2454_v63  ;;  %v2535_v63 = vld [vmem:[%s3252_s16 + $0x18] sm:$0xff]  }
 0x65e   :  { %v720_v8 = vsel %vm718_vm4, %v717_v5, %v2456_v0  ;;  %v719_v9 = vsel %vm718_vm4, %v716_v4, %v2455_v3  ;;  %2287 = vmatpush3.bf16.msra.mxu1 %v2534_v62  ;;  %v2044_v0 = vld [vmem:[%s3253_s15] ss:$0 sm:$0xff] }
 0x65f   :  { %v723_v10 = vsel %vm721_vm5, %v720_v8, %v2461_v6  ;;  %v722_v11 = vsel %vm721_vm5, %v719_v9, %v2460_v7  ;;  %2288 = vmatprep.subr.bf16.mxu1 %v2644_v15 }
 0x660   :  { %v724_v12 = vpack.c.bf16 %v723_v10, %v722_v11 }
 0x662   :  { %2271 = vmatmul.mubr.msk.bf16.vlgmr.msra.gmra.mrb[16].mxu0 %vm73_vm0, %v724_v12  ;;  %2289 = vmatpush3.bf16.msra.mxu1 %v2535_v63 }
 0x663   :  { %2278 = vmatprep.mubr.msk.bf16.mxu0 %vm2645_vm1, %v2644_v15  ;;  %2302 = vmatprep.subr.bf16.mxu1 %v2644_v15 }
 0x735   :  { %v780_v1 = vpop.f32.mrb[16].mxu0 }
 0x736   :  { %v781_v14 = vadd.f32 %v2038_v13, %v780_v1  ;;  %v2272_v16 = vpop.f32.mrb[17].mxu0 }
 0x737   :  { %v783_v17 = vpop.f32.mrb[18].mxu0 }
 0x738   :  { %v784_v18 = vadd.f32 %v2038_v13, %v783_v17  ;;  %v2273_v19 = vpop.f32.mrb[19].mxu0  ;;  %v787_v20 = vadd.f32 %v781_v14, %v2799_v33 }
 0x73a   :  { %v789_v21 = vsel %vm73_vm0, %v787_v20, 0.0  ;;  %v788_v22 = vadd.f32 %v784_v18, %v2801_v34  ;;  %v2530_v34 = vld [vmem:[%s3249_s14] sm:$0xff]  }
 0x73b   :  { %790 = vadd.xlane.f32.xlu0 %v789_v21  ;;  %2275 = vmatpush3.bf16.msra.mxu0 %v2530_v34 }
 0x73c   :  { %v792_v23 = vsel %vm73_vm0, %v788_v22, 0.0  ;;  %2276 = vmatprep.subr.bf16.mxu0 %v2644_v15 }
 0x73d   :  { %793 = vadd.xlane.f32.xlu1 %v792_v23 }
 0x73f   :  { %2277 = vmatpush3.bf16.msra.mxu0 %v2531_v38 }
 0x740   :  { %2294 = vmatprep.subr.bf16.mxu0 %v2644_v15 }
 0x7c8   :  { %v791_v24 = vpop.xlane.xlu0 %790 }
 0x7c9   :  { %v795_v25 = vmul.f32 0.03125, %v791_v24 }
 0x7ca   :  { %v794_v27 = vpop.xlane.xlu1 %793 }
 0x7cb   :  { %v797_v28 = vsub.f32 %v787_v20, %v795_v25  ;;  %v796_v29 = vmul.f32 0.03125, %v794_v27 }
 0x7cd   :  { %v798_v30 = vsub.f32 %v788_v22, %v796_v29  ;;  %v799_v35 = vmul.f32 %v797_v28, %v797_v28  ;;  %v2048_v29 = vld [vmem:[%s3254_s17] ss:$0 sm:$0xff] }
 0x7cf   :  { %v801_v36 = vsel %vm73_vm0, %v799_v35, 0.0  ;;  %v800_v37 = vmul.f32 %v798_v30, %v798_v30 }
 0x7d0   :  { %802 = vadd.xlane.f32.xlu0 %v801_v36 }
 0x7d1   :  { %v804_v33 = vsel %vm73_vm0, %v800_v37, 0.0 }
 0x7d4   :  { %805 = vadd.xlane.f32.xlu0 %v804_v33 }
 0x85d   :  { %v803_v42 = vpop.xlane.xlu0 %802 }
 0x85e   :  { %v807_v31 = vmul.f32 0.03125, %v803_v42 }
 0x860   :  { %v809_v26 = vadd.f32 1e-12, %v807_v31 }
 0x861   :  { %v806_v43 = vpop.xlane.xlu0 %805 }
 0x862   :  { %2588 = vrsqrt.f32 %v809_v26  ;;  %v808_v44 = vmul.f32 0.03125, %v806_v43 }
 0x864   :  { %v810_v41 = vadd.f32 1e-12, %v808_v44 }
 0x866   :  { %2590 = vrsqrt.f32 %v810_v41 }
 0x86c   :  { %v2589_v45 = vpop.eup %2588 }
 0x86d   :  { %v813_v46 = vmul.f32 %v2589_v45, %v797_v28 }
 0x86f   :  { %v821_v50 = vmul.f32 %v2042_v48, %v813_v46 }
 0x870   :  { %v2591_v49 = vpop.eup %2590 }
 0x871   :  { %v814_v51 = vmul.f32 %v2591_v49, %v798_v30  ;;  %v829_v54 = vadd.f32 %v2043_v52, %v821_v50 }
 0x873   :  { %v822_v53 = vmul.f32 %v2042_v48, %v814_v51 }
 0x875   :  { %v830_v55 = vadd.f32 %v2043_v52, %v822_v53  ;;  %v2536_v53 = vld [vmem:[%s3272_s3 + $0x10] sm:$0xff]  }
 0x877   :  { %v831_v58 = vpack.c.bf16 %v830_v55, %v829_v54 }
 0x879   :  { %2279 = vmatmul.mubr.msk.bf16.vlgmr.msra.gmra.mrb[20].mxu0 %vm73_vm0, %v831_v58  ;;  %v2539_v58 = vld [vmem:[%s3271_s0 + $0x18] sm:$0xff]  }
 0x87a   :  { %2298 = vmatprep.mubr.msk.bf16.mxu0 %vm2645_vm1, %v2644_v15 }
 0x94c   :  { %v887_v3 = vpop.f32.mrb[20].mxu0 }
 0x94d   :  { %v888_v4 = vadd.f32 %v2044_v0, %v887_v3  ;;  %v2280_v5 = vpop.f32.mrb[21].mxu0 }
 0x94e   :  { %v890_v6 = vpop.f32.mrb[22].mxu0  ;;  %v2054_v5 = vld [vmem:[%s3255_s18] ss:$0 sm:$0xff] }
 0x94f   :  { %v896_v7 = vmul.f32 0.044715, %v888_v4  ;;  %v891_v8 = vadd.f32 %v2044_v0, %v890_v6  ;;  %v2281_v9 = vpop.f32.mrb[23].mxu0  ;;  %v894_v22 = vmul.f32 0.5, %v888_v4 }
 0x951   :  { %v898_v10 = vmul.f32 %v896_v7, %v888_v4  ;;  %v897_v11 = vmul.f32 0.044715, %v891_v8  ;;  %v895_v23 = vmul.f32 0.5, %v891_v8 }
 0x953   :  { %v900_v12 = vmul.f32 %v898_v10, %v888_v4  ;;  %v899_v13 = vmul.f32 %v897_v11, %v891_v8  ;;  %v2055_v10 = vld [vmem:[%s3256_s19] ss:$0 sm:$0xff] }
 0x955   :  { %v902_v1 = vadd.f32 %v900_v12, %v888_v4  ;;  %v901_v14 = vmul.f32 %v899_v13, %v891_v8 }
 0x957   :  { %v904_v16 = vmul.f32 0.7978846, %v902_v1  ;;  %v903_v17 = vadd.f32 %v901_v14, %v891_v8  ;;  %v2540_v1 = vld [vmem:[%s3275_s30 + $0x10] sm:$0xff]  }
 0x959   :  { %2592 = vtanh.f32 %v904_v16  ;;  %v905_v18 = vmul.f32 0.7978846, %v903_v17  ;;  %v2541_v16 = vld [vmem:[%s3275_s30 + $0x18] sm:$0xff]   ;;  %v2094_v17 = vld [vmem:[%s3243_s5 + $0x1] ss:$0 sm:$0xff] }
 0x95b   :  { %2594 = vtanh.f32 %v905_v18 }
 0x963   :  { %v2593_v19 = vpop.eup %2592 }
 0x964   :  { %v908_v20 = vadd.f32 1.0, %v2593_v19  ;;  %v2098_v19 = vld [vmem:[%s3244_s7 + $0x1] ss:$0 sm:$0xff] }
 0x965   :  { %v2595_v21 = vpop.eup %2594 }
 0x966   :  { %v909_v24 = vadd.f32 1.0, %v2595_v21  ;;  %v910_v25 = vmul.f32 %v908_v20, %v894_v22 }
 0x968   :  { %v911_v27 = vmul.f32 %v909_v24, %v895_v23 }
 0x96a   :  { %v912_v28 = vpack.c.bf16 %v911_v27, %v910_v25 }
 0x96c   :  { %2291 = vmatmul.mubr.msk.bf16.vlgmr.msra.gmra.mrb[12].mxu1 %vm522_vm3, %v912_v28 }
 0x96d   :  { %2306 = vmatprep.mubr.msk.bf16.mxu1 %vm2645_vm1, %v2644_v15  ;;  %2303 = vmatpush3.bf16.msra.mxu1 %v2536_v53 }
 0x96e   :  { %2304 = vmatprep.subr.bf16.mxu1 %v2644_v15 }
 0xa3f   :  { %v980_v30 = vpop.f32.mrb[12].mxu1 }
 0xa40   :  { %v981_v35 = vadd.f32 %v2048_v29, %v980_v30  ;;  %v2292_v36 = vpop.f32.mrb[13].mxu1 }
 0xa41   :  { %v983_v37 = vpop.f32.mrb[14].mxu1 }
 0xa42   :  { %v984_v33 = vadd.f32 %v2048_v29, %v983_v37  ;;  %v2293_v34 = vpop.f32.mrb[15].mxu1  ;;  %v987_v38 = vadd.f32 %v981_v35, %v829_v54  ;;  %v2537_v54 = vld [vmem:[%s3271_s0 + $0x10] sm:$0xff]  }
 0xa43   :  { %2295 = vmatpush3.bf16.msra.mxu0 %v2537_v54 }
 0xa44   :  { %v989_v42 = vsel %vm73_vm0, %v987_v38, 0.0  ;;  %v988_v31 = vadd.f32 %v984_v33, %v830_v55  ;;  %v2538_v55 = vld [vmem:[%s3272_s3 + $0x18] sm:$0xff]   ;;  %2296 = vmatprep.subr.bf16.mxu0 %v2644_v15 }
 0xa45   :  { %990 = vadd.xlane.f32.xlu0 %v989_v42  ;;  %2305 = vmatpush3.bf16.msra.mxu1 %v2538_v55  ;;  %v2102_v42 = vld [vmem:[%s3245_s9 + $0x1] ss:$0 sm:$0xff] }
 0xa46   :  { %v992_v26 = vsel %vm73_vm0, %v988_v31, 0.0 }
 0xa47   :  { %993 = vadd.xlane.f32.xlu1 %v992_v26  ;;  %2297 = vmatpush3.bf16.msra.mxu0 %v2539_v58 }
 0xa48   :  { %2310 = vmatprep.subr.bf16.mxu0 %v2644_v15 }
 0xad2   :  { %v991_v43 = vpop.xlane.xlu0 %990 }
 0xad3   :  { %v995_v44 = vmul.f32 0.03125, %v991_v43 }
 0xad4   :  { %v994_v41 = vpop.xlane.xlu1 %993 }
 0xad5   :  { %v997_v45 = vsub.f32 %v987_v38, %v995_v44  ;;  %v996_v46 = vmul.f32 0.03125, %v994_v41 }
 0xad7   :  { %v998_v48 = vsub.f32 %v988_v31, %v996_v46  ;;  %v999_v49 = vmul.f32 %v997_v45, %v997_v45 }
 0xad9   :  { %v1001_v50 = vsel %vm73_vm0, %v999_v49, 0.0  ;;  %v1000_v51 = vmul.f32 %v998_v48, %v998_v48 }
 0xada   :  { %1002 = vadd.xlane.f32.xlu0 %v1001_v50 }
 0xadb   :  { %v1004_v52 = vsel %vm73_vm0, %v1000_v51, 0.0 }
 0xadc   :  { %1005 = vadd.xlane.f32.xlu1 %v1004_v52 }
 0xb67   :  { %v1003_v59 = vpop.xlane.xlu0 %1002 }
 0xb68   :  { %v1007_v61 = vmul.f32 0.03125, %v1003_v59 }
 0xb69   :  { %v1006_v62 = vpop.xlane.xlu1 %1005 }
 0xb6a   :  { %v1009_v63 = vadd.f32 1e-12, %v1007_v61  ;;  %v1008_v0 = vmul.f32 0.03125, %v1006_v62 }
 0xb6c   :  { %2596 = vrsqrt.f32 %v1009_v63  ;;  %v1010_v3 = vadd.f32 1e-12, %v1008_v0 }
 0xb6e   :  { %2598 = vrsqrt.f32 %v1010_v3 }
 0xb76   :  { %v2597_v4 = vpop.eup %2596 }
 0xb77   :  { %v1013_v6 = vmul.f32 %v2597_v4, %v997_v45 }
 0xb78   :  { %v2599_v7 = vpop.eup %2598 }
 0xb79   :  { %v1021_v8 = vmul.f32 %v2054_v5, %v1013_v6  ;;  %v1014_v9 = vmul.f32 %v2599_v7, %v998_v48 }
 0xb7b   :  { %v1022_v11 = vmul.f32 %v2054_v5, %v1014_v9  ;;  %v3042_v12 = vadd.f32 %v2055_v10, %v1021_v8 }
 0xb7d   :  { %v3044_v13 = vadd.f32 %v2055_v10, %v1022_v11 }
 0xb7f   :  { %v1085_v14 = vpack.c.bf16 %v3044_v13, %v3042_v12 }
 0xb81   :  { %2299 = vmatmul.mubr.msk.bf16.vlgmr.msra.gmra.mrb[24].mxu0 %vm73_vm0, %v1085_v14  ;;  %2307 = vmatmul.mubr.msk.bf16.vlgmr.msra.gmra.mrb[16].mxu1 %vm73_vm0, %v1085_v14 }
 0xb82   :  { %2311 = vmatpush3.bf16.msra.mxu0 %v2540_v1  ;;  %2314 = vmatprep.mubr.msk.bf16.mxu0 %vm2645_vm1, %v2644_v15 }
 0xb83   :  { %2312 = vmatprep.subr.bf16.mxu0 %v2644_v15 }
 0xb86   :  { %2313 = vmatpush3.bf16.msra.mxu0 %v2541_v16 }
 0xb89   :  { %2315 = vmatmul.mubr.msk.bf16.vlgmr.msra.gmra.mrb[28].mxu0 %vm73_vm0, %v1085_v14 }
 0xc54   :  { %v1141_v18 = vpop.f32.mrb[24].mxu0  ;;  %v1200_v20 = vpop.f32.mrb[16].mxu1 }
 0xc55   :  { %v2300_v21 = vpop.f32.mrb[25].mxu0  ;;  %v2308_v22 = vpop.f32.mrb[17].mxu1  ;;  %v1142_v25 = vadd.f32 %v2094_v17, %v1141_v18  ;;  %v1201_v27 = vadd.f32 %v2098_v19, %v1200_v20 }
 0xc56   :  { %v1144_v23 = vpop.f32.mrb[26].mxu0  ;;  %v1203_v24 = vpop.f32.mrb[18].mxu1 }
 0xc57   :  { %v1145_v28 = vadd.f32 %v2094_v17, %v1144_v23  ;;  %v1204_v29 = vadd.f32 %v2098_v19, %v1203_v24  ;;  %v2301_v30 = vpop.f32.mrb[27].mxu0  ;;  %v2309_v35 = vpop.f32.mrb[19].mxu1 }
 0xc59   :  { %v2467_v36 = vpack.i.bf16 %v1204_v29, %v1201_v27  ;;  %v1310_v37 = vpack.c.bf16 %v1204_v29, %v1201_v27  ;;  %v1286_v33 = vpack.c.bf16 %v1145_v28, %v1142_v25  ;;  %v2482_v34 = vpack.i.bf16 %v1145_v28, %v1142_v25 }
 0xc5b   :  { %2468 = vrot.lane.b32.xlu1 %v2467_v36, %s2646_s26  ;;  %2463 = vrot.lane.b32.xlu0 %v2467_v36, %s2647_s27  ;;  %v1351_v38 = vsel %vm416_vm2, %v1310_v37, 0 }
 0xc5c   :  { %2390 = vmatprep.subr.msk.bf16.mxu1 %vm416_vm2, %v1310_v37  ;;  %2326 = vmatprep.mubr.msk.bf16.mxu1 %vm416_vm2, %v1286_v33  ;;  %v1259_v31 = vpop.f32.mrb[28].mxu0 }
 0xc5d   :  { %2319 = vmatpush3.bf16.xpose.msra.mxu1 %v1351_v38  ;;  %v2316_v26 = vpop.f32.mrb[29].mxu0  ;;  %v1260_v44 = vadd.f32 %v2102_v42, %v1259_v31 }
 0xc5e   :  { %v1262_v43 = vpop.f32.mrb[30].mxu0 }
 0xc5f   :  { %v1263_v41 = vadd.f32 %v2102_v42, %v1262_v43  ;;  %2473 = vrot.lane.b32.xlu1 %v2467_v36, %s2648_s29  ;;  %2483 = vrot.lane.b32.xlu0 %v2482_v34, %s2646_s26  ;;  %v2317_v45 = vpop.f32.mrb[31].mxu0 }
 0xc61   :  { %v1334_v46 = vpack.c.bf16 %v1263_v41, %v1260_v44  ;;  %v3076_v48 = vpack.i.bf16 %v1263_v41, %v1260_v44 }
 0xc63   :  { %2478 = vrot.lane.b32.xlu1 %v2482_v34, %s2647_s27  ;;  %2334 = vmatprep.subr.bf16.mxu0 %v1334_v46 }
 0xc64   :  { %2335 = vmatpush3.bf16.msra.mxu0 %v1334_v46 }
 0xc67   :  { %2488 = vrot.lane.b32.xlu1 %v2482_v34, %s2648_s29 }
 0xccd   :  { %v2469_v49 = vpop.permute.xlu1 %2468  ;;  %v2464_v50 = vpop.permute.xlu0 %2463 }
 0xcce   :  { %v2466_v51 = vunpack.i.h.bf16 %v2464_v50  ;;  %v2465_v52 = vunpack.i.l.bf16 %v2464_v50  ;;  %v2471_v53 = vunpack.i.h.bf16 %v2469_v49  ;;  %v2470_v54 = vunpack.i.l.bf16 %v2469_v49 }
 0xcd0   :  { %v1311_v55 = vpack.c.bf16 %v2466_v51, %v2465_v52  ;;  %v1312_v58 = vpack.c.bf16 %v2471_v53, %v2470_v54 }
 0xcd1   :  { %v2474_v61 = vpop.permute.xlu1 %2473  ;;  %v2484_v5 = vpop.permute.xlu0 %2483 }
 0xcd2   :  { %2391 = vmatprep.subr.msk.bf16.mxu1 %vm416_vm2, %v1311_v55  ;;  %v1354_v59 = vsel %vm416_vm2, %v1311_v55, 0  ;;  %v2476_v62 = vunpack.i.h.bf16 %v2474_v61  ;;  %v2475_v63 = vunpack.i.l.bf16 %v2474_v61  ;;  %v1357_v3 = vsel %vm416_vm2, %v1312_v58, 0 }
 0xcd3   :  { %2321 = vmatpush3.bf16.xpose.msra.mxu1 %v1354_v59  ;;  %v2486_v9 = vunpack.i.h.bf16 %v2484_v5  ;;  %v2485_v10 = vunpack.i.l.bf16 %v2484_v5 }
 0xcd4   :  { %2392 = vmatprep.subr.msk.bf16.mxu1 %vm416_vm2, %v1312_v58  ;;  %v1313_v0 = vpack.c.bf16 %v2476_v62, %v2475_v63 }
 0xcd5   :  { %v2479_v4 = vpop.permute.xlu1 %2478  ;;  %v1288_v1 = vpack.c.bf16 %v2486_v9, %v2485_v10 }
 0xcd6   :  { %v1360_v6 = vsel %vm416_vm2, %v1313_v0, 0  ;;  %v2481_v7 = vunpack.i.h.bf16 %v2479_v4  ;;  %v2480_v8 = vunpack.i.l.bf16 %v2479_v4 }
 0xcd8   :  { %v1287_v11 = vpack.c.bf16 %v2481_v7, %v2480_v8 }
 0xcd9   :  { %v2489_v14 = vpop.permute.xlu1 %2488 }
 0xcda   :  { %v2491_v16 = vunpack.i.h.bf16 %v2489_v14  ;;  %v2490_v17 = vunpack.i.l.bf16 %v2489_v14 }
 0xcdb   :  { %2323 = vmatpush3.bf16.xpose.msra.mxu1 %v1357_v3 }
 0xcdc   :  { %2393 = vmatprep.subr.msk.bf16.mxu1 %vm416_vm2, %v1313_v0  ;;  %v1289_v18 = vpack.c.bf16 %v2491_v16, %v2490_v17 }
 0xce3   :  { %2325 = vmatpush3.bf16.xpose.msra.mxu1 %v1360_v6 }
 0xce4   :  { %2366 = vmatprep.subr.bf16.mxu1 %v2644_v15 }
 0xcea   :  { %2327 = vmatmul.mubr.msk.bf16.vlgmr.msra.gmra.mrb[20].mxu1 %vm416_vm2, %v1287_v11 }
 0xceb   :  { %2330 = vmatprep.mubr.msk.bf16.mxu1 %vm416_vm2, %v1288_v1 }
 0xcf2   :  { %2331 = vmatmul.mubr.msk.bf16.gmra.mrb[24].mxu1 %vm416_vm2, %v1289_v18 }
 0xcf3   :  { %2374 = vmatprep.mubr.msk.bf16.mxu1 %vm2645_vm1, %v2644_v15 }
 0xdbd   :  { %v2328_v19 = vpop.f32.mrb[20].mxu1 }
 0xdbe   :  { %v1396_v20 = vpop.f32.mrb[21].mxu1  ;;  %v1429_v21 = vmul.f32 0.35355338, %v2328_v19 }
 0xdbf   :  { %v1427_v22 = vmul.f32 0.35355338, %v1396_v20  ;;  %v2329_v23 = vpop.f32.mrb[22].mxu1 }
 0xdc0   :  { %v1399_v24 = vpop.f32.mrb[23].mxu1  ;;  %v1430_v28 = vmul.f32 0.35355338, %v2329_v23  ;;  %v1437_v35 = vadd.f32 %v1429_v21, %v2862_v40 }
 0xdc1   :  { %v1428_v25 = vmul.f32 0.35355338, %v1399_v24  ;;  %v1435_v27 = vadd.f32 %v1427_v22, %v2852_v32 }
 0xdc2   :  { %v1449_v42 = vsel %vm522_vm3, %v1437_v35, -inf  ;;  %v1438_v31 = vadd.f32 %v1430_v28, %v2871_v47 }
 0xdc3   :  { %v1443_v29 = vsel %vm522_vm3, %v1435_v27, -inf  ;;  %v1436_v30 = vadd.f32 %v1428_v25, %v2857_v39 }
 0xdc4   :  { %1444 = vmax.xlane.f32.xlu0 %v1443_v29  ;;  %v1452_v39 = vsel %vm522_vm3, %v1438_v31, -inf }
 0xdc5   :  { %v2332_v36 = vpop.f32.mrb[24].mxu1  ;;  %v1446_v37 = vsel %vm522_vm3, %v1436_v30, -inf }
 0xdc6   :  { %1447 = vmax.xlane.f32.xlu1 %v1446_v37  ;;  %v1412_v33 = vpop.f32.mrb[25].mxu1  ;;  %v1433_v44 = vmul.f32 0.35355338, %v2332_v36 }
 0xdc7   :  { %v1431_v34 = vmul.f32 0.35355338, %v1412_v33  ;;  %v2333_v38 = vpop.f32.mrb[26].mxu1 }
 0xdc8   :  { %1450 = vmax.xlane.f32.xlu0 %v1449_v42  ;;  %v1415_v32 = vpop.f32.mrb[27].mxu1  ;;  %v1434_v26 = vmul.f32 0.35355338, %v2333_v38  ;;  %v1441_v47 = vadd.f32 %v1433_v44, %v2899_v2 }
 0xdc9   :  { %v1432_v43 = vmul.f32 0.35355338, %v1415_v32  ;;  %v1439_v41 = vadd.f32 %v1431_v34, %v2884_v57 }
 0xdca   :  { %v1442_v46 = vadd.f32 %v1434_v26, %v2889_v60  ;;  %v1461_v51 = vsel %vm522_vm3, %v1441_v47, -inf }
 0xdcb   :  { %v1440_v40 = vadd.f32 %v1432_v43, %v2879_v56  ;;  %v1455_v49 = vsel %vm522_vm3, %v1439_v41, -inf }
 0xdcc   :  { %1453 = vmax.xlane.f32.xlu0 %v1452_v39  ;;  %v1464_v50 = vsel %vm522_vm3, %v1442_v46, -inf }
 0xdcd   :  { %v1458_v45 = vsel %vm522_vm3, %v1440_v40, -inf }
 0xdce   :  { %1459 = vmax.xlane.f32.xlu1 %v1458_v45 }
 0xdd0   :  { %1456 = vmax.xlane.f32.xlu0 %v1455_v49 }
 0xdd2   :  { %1465 = vmax.xlane.f32.xlu1 %v1464_v50 }
 0xdd4   :  { %1462 = vmax.xlane.f32.xlu0 %v1461_v51 }
 0xe51   :  { %v1445_v56 = vpop.xlane.xlu0 %1444 }
 0xe52   :  { %v1467_v52 = vsub.f32 %v1435_v27, %v1445_v56 }
 0xe53   :  { %v1448_v57 = vpop.xlane.xlu1 %1447 }
 0xe54   :  { %v1475_v55 = vmul.f32 1.442695, %v1467_v52  ;;  %v1468_v58 = vsub.f32 %v1436_v30, %v1448_v57 }
 0xe55   :  { %v1451_v53 = vpop.xlane.xlu0 %1450 }
 0xe56   :  { %v1469_v54 = vsub.f32 %v1437_v35, %v1451_v53  ;;  %v1477_v2 = vmul.f32 1.442695, %v1468_v58 }
 0xe58   :  { %v1479_v60 = vmul.f32 1.442695, %v1469_v54 }
 0xe59   :  { %v1454_v59 = vpop.xlane.xlu0 %1453 }
 0xe5a   :  { %2600 = vpow2.f32 %v1479_v60  ;;  %v1470_v61 = vsub.f32 %v1438_v31, %v1454_v59 }
 0xe5b   :  { %2602 = vpow2.f32 %v1475_v55  ;;  %v1460_v21 = vpop.xlane.xlu1 %1459 }
 0xe5c   :  { %v1481_v62 = vmul.f32 1.442695, %v1470_v61  ;;  %v1472_v24 = vsub.f32 %v1440_v40, %v1460_v21 }
 0xe5d   :  { %v1457_v63 = vpop.xlane.xlu0 %1456 }
 0xe5e   :  { %2604 = vpow2.f32 %v1481_v62  ;;  %v1471_v0 = vsub.f32 %v1439_v41, %v1457_v63  ;;  %v1485_v27 = vmul.f32 1.442695, %v1472_v24 }
 0xe5f   :  { %2606 = vpow2.f32 %v1477_v2  ;;  %v1466_v22 = vpop.xlane.xlu1 %1465 }
 0xe60   :  { %v1483_v6 = vmul.f32 1.442695, %v1471_v0  ;;  %v1474_v23 = vsub.f32 %v1442_v46, %v1466_v22 }
 0xe61   :  { %v1463_v3 = vpop.xlane.xlu0 %1462 }
 0xe62   :  { %v1473_v4 = vsub.f32 %v1441_v47, %v1463_v3  ;;  %v1489_v25 = vmul.f32 1.442695, %v1474_v23 }
 0xe64   :  { %v3108_v5 = vpop.eup %2600  ;;  %v1487_v7 = vmul.f32 1.442695, %v1473_v4 }
 0xe65   :  { %v1497_v8 = vsel %vm522_vm3, %v3108_v5, 0.0  ;;  %v2603_v9 = vpop.eup %2602 }
 0xe66   :  { %2608 = vpow2.f32 %v1487_v7  ;;  %1498 = vadd.xlane.f32.xlu0 %v1497_v8  ;;  %v1491_v11 = vsel %vm522_vm3, %v2603_v9, 0.0  ;;  %v2542_v8 = vld [vmem:[%s3247_s10 + $0x10] sm:$0xff]  }
 0xe67   :  { %2610 = vpow2.f32 %v1483_v6 }
 0xe68   :  { %v3112_v10 = vpop.eup %2604  ;;  %2612 = vpow2.f32 %v1489_v25 }
 0xe69   :  { %v1500_v1 = vsel %vm522_vm3, %v3112_v10, 0.0  ;;  %v2607_v14 = vpop.eup %2606  ;;  %2614 = vpow2.f32 %v1485_v27 }
 0xe6a   :  { %1492 = vadd.xlane.f32.xlu0 %v1491_v11  ;;  %1501 = vadd.xlane.f32.xlu1 %v1500_v1  ;;  %v1494_v16 = vsel %vm522_vm3, %v2607_v14, 0.0 }
 0xe6e   :  { %1495 = vadd.xlane.f32.xlu1 %v1494_v16 }
 0xe70   :  { %v3118_v17 = vpop.eup %2608 }
 0xe71   :  { %v1509_v18 = vsel %vm522_vm3, %v3118_v17, 0.0  ;;  %v3122_v19 = vpop.eup %2610 }
 0xe72   :  { %1510 = vadd.xlane.f32.xlu0 %v1509_v18  ;;  %v1503_v20 = vsel %vm522_vm3, %v3122_v19, 0.0  ;;  %v2613_v28 = vpop.eup %2612 }
 0xe73   :  { %v1512_v29 = vsel %vm522_vm3, %v2613_v28, 0.0  ;;  %v2615_v30 = vpop.eup %2614 }
 0xe74   :  { %v1506_v35 = vsel %vm522_vm3, %v2615_v30, 0.0 }
 0xe76   :  { %1504 = vadd.xlane.f32.xlu0 %v1503_v20 }
 0xe7f   :  { %2498 = vrot.lane.b32.xlu1 %v3076_v48, %s2646_s26 }
 0xe8c   :  { %2493 = vrot.lane.b32.xlu0 %v3076_v48, %s2647_s27 }
 0xea3   :  { %1513 = vadd.xlane.f32.xlu1 %v1512_v29 }
 0xea7   :  { %1507 = vadd.xlane.f32.xlu1 %v1506_v35 }
 0xeb8   :  { %2503 = vrot.lane.b32.xlu1 %v3076_v48, %s2648_s29  ;;  %s3276_s29 = smov 16  }
 0xef3   :  { %v1499_v36 = vpop.xlane.xlu0 %1498 }
 0xef7   :  { %v1493_v37 = vpop.xlane.xlu0 %1492  ;;  %v1502_v33 = vpop.xlane.xlu1 %1501 }
 0xef8   :  { %2616 = vrcp.f32 %v1493_v37 }
 0xefb   :  { %v1496_v34 = vpop.xlane.xlu1 %1495 }
 0xefc   :  { %2618 = vrcp.f32 %v1496_v34 }
 0xefd   :  { %2620 = vrcp.f32 %v1502_v33 }
 0xefe   :  { %2622 = vrcp.f32 %v1499_v36 }
 0xeff   :  { %v1511_v38 = vpop.xlane.xlu0 %1510  ;;  %v2499_v32 = vpop.permute.xlu1 %2498 }
 0xf00   :  { %v2501_v40 = vunpack.i.h.bf16 %v2499_v32  ;;  %v2500_v41 = vunpack.i.l.bf16 %v2499_v32 }
 0xf02   :  { %v2617_v31 = vpop.eup %2616  ;;  %v1336_v47 = vpack.c.bf16 %v2501_v40, %v2500_v41 }
 0xf03   :  { %v1505_v42 = vpop.xlane.xlu0 %1504  ;;  %v1523_v44 = vmul.f32 %v2617_v31, %v2603_v9  ;;  %v2543_v9 = vld [vmem:[%s3247_s10 + $0x18] sm:$0xff]  }
 0xf04   :  { %2624 = vrcp.f32 %v1505_v42 }
 0xf06   :  { %v2619_v26 = vpop.eup %2618 }
 0xf07   :  { %v2494_v43 = vpop.permute.xlu0 %2493  ;;  %v1524_v39 = vmul.f32 %v2619_v26, %v2607_v14  ;;  %v2621_v56 = vpop.eup %2620  ;;  %v2114_v26 = vld [vmem:[%s3248_s11 + $0x1] ss:$0 sm:$0xff] }
 0xf08   :  { %v2496_v45 = vunpack.i.h.bf16 %v2494_v43  ;;  %v2495_v46 = vunpack.i.l.bf16 %v2494_v43  ;;  %v2623_v54 = vpop.eup %2622  ;;  %v1526_v55 = vmul.f32 %v2621_v56, %v3112_v10 }
 0xf09   :  { %v1531_v49 = vpack.c.bf16 %v1524_v39, %v1523_v44  ;;  %v1525_v59 = vmul.f32 %v2623_v54, %v3108_v5 }
 0xf0a   :  { %v1335_v48 = vpack.c.bf16 %v2496_v45, %v2495_v46 }
 0xf0b   :  { %2342 = vmatprep.mubr.msk.bf16.mxu0 %vm522_vm3, %v1531_v49  ;;  %v1532_v2 = vpack.c.bf16 %v1526_v55, %v1525_v59 }
 0xf0c   :  { %2336 = vmatprep.subr.bf16.mxu0 %v1335_v48 }
 0xf0d   :  { %2337 = vmatpush3.bf16.msra.mxu0 %v1335_v48 }
 0xf0e   :  { %2338 = vmatprep.subr.bf16.mxu0 %v1336_v47  ;;  %v2625_v60 = vpop.eup %2624 }
 0xf0f   :  { %v1527_v63 = vmul.f32 %v2625_v60, %v3122_v19  ;;  %v2545_v60 = vld [vmem:[%s3249_s14 + $0x18] sm:$0xff]  }
 0xf11   :  { %2339 = vmatpush3.bf16.msra.mxu0 %v1336_v47 }
 0xf30   :  { %v1514_v50 = vpop.xlane.xlu1 %1513 }
 0xf34   :  { %v1508_v51 = vpop.xlane.xlu1 %1507 }
 0xf35   :  { %2626 = vrcp.f32 %v1508_v51 }
 0xf36   :  { %2628 = vrcp.f32 %v1514_v50 }
 0xf37   :  { %2630 = vrcp.f32 %v1511_v38 }
 0xf38   :  { %v2504_v52 = vpop.permute.xlu1 %2503 }
 0xf39   :  { %v2506_v57 = vunpack.i.h.bf16 %v2504_v52  ;;  %v2505_v53 = vunpack.i.l.bf16 %v2504_v52 }
 0xf3b   :  { %v1337_v58 = vpack.c.bf16 %v2506_v57, %v2505_v53 }
 0xf3d   :  { %2340 = vmatprep.subr.bf16.mxu0 %v1337_v58 }
 0xf3e   :  { %2341 = vmatpush3.bf16.msra.mxu0 %v1337_v58 }
 0xf3f   :  { %v2627_v61 = vpop.eup %2626  ;;  %2350 = vmatprep.subr.bf16.mxu0 %v2644_v15 }
 0xf40   :  { %v2629_v62 = vpop.eup %2628  ;;  %v1528_v0 = vmul.f32 %v2627_v61, %v2615_v30 }
 0xf41   :  { %2343 = vmatmul.mubr.msk.bf16.vlgmr.msra.gmra.mrb[32].mxu0 %vm522_vm3, %v1532_v2  ;;  %v2631_v3 = vpop.eup %2630  ;;  %v1530_v6 = vmul.f32 %v2629_v62, %v2613_v28 }
 0xf42   :  { %v1533_v4 = vpack.c.bf16 %v1528_v0, %v1527_v63  ;;  %v1529_v7 = vmul.f32 %v2631_v3, %v3118_v17  ;;  %2351 = vmatpush3.bf16.msra.mxu0 %v2542_v8 }
 0xf43   :  { %2352 = vmatprep.subr.bf16.mxu0 %v2644_v15 }
 0xf44   :  { %2346 = vmatprep.mubr.msk.bf16.mxu0 %vm522_vm3, %v1533_v4  ;;  %v1534_v5 = vpack.c.bf16 %v1530_v6, %v1529_v7  ;;  %v2118_v6 = vld [vmem:[%s3250_s12 + $0x1] ss:$0 sm:$0xff] }
 0xf46   :  { %2353 = vmatpush3.bf16.msra.mxu0 %v2543_v9  ;;  %v2119_v9 = vld [vmem:[%s3251_s13 + $0x1] ss:$0 sm:$0xff] }
 0xf47   :  { %2358 = vmatprep.subr.bf16.mxu0 %v2644_v15 }
 0xf49   :  { %2347 = vmatmul.mubr.msk.bf16.gmra.mrb[36].mxu0 %vm522_vm3, %v1534_v5 }
 0xf4a   :  { %2354 = vmatprep.mubr.msk.bf16.mxu0 %vm2645_vm1, %v2644_v15 }
0x1014   :  { %v2344_v10 = vpop.f32.mrb[32].mxu0 }
0x1015   :  { %v1581_v11 = vpop.f32.mrb[33].mxu0 }
0x1016   :  { %v2345_v1 = vpop.f32.mrb[34].mxu0 }
0x1017   :  { %v2507_v14 = vpack.i.bf16 %v2345_v1, %v2344_v10  ;;  %v1584_v16 = vpop.f32.mrb[35].mxu0 }
0x1019   :  { %2508 = vrot.lane.b32.xlu1 %v2507_v14, %s2649_s22 }
0x101c   :  { %v2348_v17 = vpop.f32.mrb[36].mxu0 }
0x101d   :  { %v1597_v18 = vpop.f32.mrb[37].mxu0 }
0x101e   :  { %v2349_v19 = vpop.f32.mrb[38].mxu0 }
0x101f   :  { %v2517_v20 = vpack.i.bf16 %v2349_v19, %v2348_v17  ;;  %v1600_v21 = vpop.f32.mrb[39].mxu0  ;;  %v2547_v17 = vld [vmem:[%s3252_s16 + $0x28] sm:$0xff]   ;;  %v2549_v19 = vld [vmem:[%s3252_s16 + $0x38] sm:$0xff]  }
0x1020   :  { %v2512_v22 = vpack.i.bf16 %v1600_v21, %v1597_v18  ;;  %v2548_v18 = vld [vmem:[%s3252_s16 + $0x30] sm:$0xff]  }
0x1021   :  { %2518 = vrot.lane.b32.xlu1 %v2517_v20, %s2650_s23  ;;  %v2120_v20 = vld [vmem:[%s3253_s15 + $0x1] ss:$0 sm:$0xff] }
0x1022   :  { %2513 = vrot.lane.b32.xlu0 %v2512_v22, %s3276_s29 }
0x108b   :  { %v2509_v23 = vpop.permute.xlu1 %2508 }
0x108c   :  { %v2511_v24 = vunpack.i.h.bf16 %v2509_v23  ;;  %v2510_v25 = vunpack.i.l.bf16 %v2509_v23 }
0x108e   :  { %v1636_v35 = vsel %vm416_vm2, %v1581_v11, %v2510_v25  ;;  %v1637_v36 = vsel %vm416_vm2, %v1584_v16, %v2511_v24  ;;  %v2546_v16 = vld [vmem:[%s3252_s16 + $0x20] sm:$0xff]  }
0x108f   :  { %2367 = vmatpush3.bf16.msra.mxu1 %v2546_v16 }
0x1090   :  { %2368 = vmatprep.subr.bf16.mxu1 %v2644_v15 }
0x1093   :  { %v2519_v27 = vpop.permute.xlu1 %2518  ;;  %2369 = vmatpush3.bf16.msra.mxu1 %v2547_v17 }
0x1094   :  { %v2514_v28 = vpop.permute.xlu0 %2513  ;;  %v2521_v37 = vunpack.i.h.bf16 %v2519_v27  ;;  %v2520_v33 = vunpack.i.l.bf16 %v2519_v27  ;;  %2370 = vmatprep.subr.bf16.mxu1 %v2644_v15 }
0x1095   :  { %v2516_v29 = vunpack.i.h.bf16 %v2514_v28  ;;  %v2515_v30 = vunpack.i.l.bf16 %v2514_v28 }
0x1097   :  { %v1639_v34 = vsel %vm718_vm4, %v1637_v36, %v2516_v29  ;;  %v1638_v38 = vsel %vm718_vm4, %v1636_v35, %v2515_v30  ;;  %2371 = vmatpush3.bf16.msra.mxu1 %v2548_v18 }
0x1098   :  { %v1641_v42 = vsel %vm721_vm5, %v1639_v34, %v2521_v37  ;;  %v1640_v31 = vsel %vm721_vm5, %v1638_v38, %v2520_v33  ;;  %2372 = vmatprep.subr.bf16.mxu1 %v2644_v15 }
0x1099   :  { %v1642_v32 = vpack.c.bf16 %v1641_v42, %v1640_v31 }
0x109b   :  { %2355 = vmatmul.mubr.msk.bf16.vlgmr.msra.gmra.mrb[40].mxu0 %vm73_vm0, %v1642_v32  ;;  %2373 = vmatpush3.bf16.msra.mxu1 %v2549_v19 }
0x109c   :  { %2362 = vmatprep.mubr.msk.bf16.mxu0 %vm2645_vm1, %v2644_v15 }
0x116e   :  { %v1698_v43 = vpop.f32.mrb[40].mxu0 }
0x116f   :  { %v1699_v44 = vadd.f32 %v2114_v26, %v1698_v43  ;;  %v2356_v39 = vpop.f32.mrb[41].mxu0 }
0x1170   :  { %v1701_v40 = vpop.f32.mrb[42].mxu0 }
0x1171   :  { %v1702_v41 = vadd.f32 %v2114_v26, %v1701_v40  ;;  %v2357_v45 = vpop.f32.mrb[43].mxu0  ;;  %v1705_v46 = vadd.f32 %v1699_v44, %v3042_v12 }
0x1173   :  { %v1707_v49 = vsel %vm73_vm0, %v1705_v46, 0.0  ;;  %v1706_v48 = vadd.f32 %v1702_v41, %v3044_v13  ;;  %v2544_v13 = vld [vmem:[%s3249_s14 + $0x10] sm:$0xff]  }
0x1174   :  { %1708 = vadd.xlane.f32.xlu0 %v1707_v49  ;;  %2359 = vmatpush3.bf16.msra.mxu0 %v2544_v13 }
0x1175   :  { %v1710_v47 = vsel %vm73_vm0, %v1706_v48, 0.0  ;;  %2360 = vmatprep.subr.bf16.mxu0 %v2644_v15 }
0x1176   :  { %1711 = vadd.xlane.f32.xlu1 %v1710_v47 }
0x1178   :  { %2361 = vmatpush3.bf16.msra.mxu0 %v2545_v60 }
0x1179   :  { %2378 = vmatprep.subr.bf16.mxu0 %v2644_v15 }
0x1201   :  { %v1709_v50 = vpop.xlane.xlu0 %1708 }
0x1202   :  { %v1713_v51 = vmul.f32 0.03125, %v1709_v50 }
0x1203   :  { %v1712_v56 = vpop.xlane.xlu1 %1711 }
0x1204   :  { %v1715_v52 = vsub.f32 %v1705_v46, %v1713_v51  ;;  %v1714_v57 = vmul.f32 0.03125, %v1712_v56  ;;  %v2124_v46 = vld [vmem:[%s3254_s17 + $0x1] ss:$0 sm:$0xff] }
0x1206   :  { %v1716_v53 = vsub.f32 %v1706_v48, %v1714_v57  ;;  %v1717_v54 = vmul.f32 %v1715_v52, %v1715_v52 }
0x1208   :  { %v1719_v55 = vsel %vm73_vm0, %v1717_v54, 0.0  ;;  %v1718_v58 = vmul.f32 %v1716_v53, %v1716_v53 }
0x1209   :  { %1720 = vadd.xlane.f32.xlu0 %v1719_v55 }
0x120a   :  { %v1722_v12 = vsel %vm73_vm0, %v1718_v58, 0.0 }
0x120d   :  { %1723 = vadd.xlane.f32.xlu0 %v1722_v12 }
0x1296   :  { %v1721_v59 = vpop.xlane.xlu0 %1720 }
0x1297   :  { %v1725_v61 = vmul.f32 0.03125, %v1721_v59 }
0x1299   :  { %v1727_v2 = vadd.f32 1e-12, %v1725_v61 }
0x129a   :  { %v1724_v62 = vpop.xlane.xlu0 %1723 }
0x129b   :  { %2632 = vrsqrt.f32 %v1727_v2  ;;  %v1726_v63 = vmul.f32 0.03125, %v1724_v62 }
0x129d   :  { %v1728_v0 = vadd.f32 1e-12, %v1726_v63 }
0x129f   :  { %2634 = vrsqrt.f32 %v1728_v0  ;;  %v2550_v0 = vld [vmem:[%s3257_s20] sm:$0xff]  }
0x12a5   :  { %v2633_v3 = vpop.eup %2632 }
0x12a6   :  { %v1731_v4 = vmul.f32 %v2633_v3, %v1715_v52  ;;  %v2551_v3 = vld [vmem:[%s3257_s20 + $0x8] sm:$0xff]  }
0x12a8   :  { %v1739_v5 = vmul.f32 %v2118_v6, %v1731_v4 }
0x12a9   :  { %v2635_v7 = vpop.eup %2634 }
0x12aa   :  { %v1732_v8 = vmul.f32 %v2635_v7, %v1716_v53  ;;  %v1747_v11 = vadd.f32 %v2119_v9, %v1739_v5 }
0x12ac   :  { %v1740_v10 = vmul.f32 %v2118_v6, %v1732_v8 }
0x12ae   :  { %v1748_v1 = vadd.f32 %v2119_v9, %v1740_v10 }
0x12b0   :  { %v1749_v14 = vpack.c.bf16 %v1748_v1, %v1747_v11 }
0x12b2   :  { %2363 = vmatmul.mubr.msk.bf16.vlgmr.msra.gmra.mrb[44].mxu0 %vm73_vm0, %v1749_v14 }
0x12b3   :  { %2382 = vmatprep.mubr.msk.bf16.mxu0 %vm2645_vm1, %v2644_v15  ;;  %2379 = vmatpush3.bf16.msra.mxu0 %v2550_v0 }
0x12b4   :  { %2380 = vmatprep.subr.bf16.mxu0 %v2644_v15  ;;  %v2131_v15 = vld [vmem:[%s3256_s19 + $0x1] ss:$0 sm:$0xff] }
0x12b7   :  { %2381 = vmatpush3.bf16.msra.mxu0 %v2551_v3 }
0x1385   :  { %v1805_v21 = vpop.f32.mrb[44].mxu0 }
0x1386   :  { %v1806_v22 = vadd.f32 %v2120_v20, %v1805_v21  ;;  %v2364_v23 = vpop.f32.mrb[45].mxu0 }
0x1387   :  { %v1808_v24 = vpop.f32.mrb[46].mxu0 }
0x1388   :  { %v1814_v25 = vmul.f32 0.044715, %v1806_v22  ;;  %v1809_v27 = vadd.f32 %v2120_v20, %v1808_v24  ;;  %v2365_v28 = vpop.f32.mrb[47].mxu0  ;;  %v1812_v43 = vmul.f32 0.5, %v1806_v22 }
0x138a   :  { %v1816_v29 = vmul.f32 %v1814_v25, %v1806_v22  ;;  %v1815_v30 = vmul.f32 0.044715, %v1809_v27  ;;  %v1813_v44 = vmul.f32 0.5, %v1809_v27 }
0x138c   :  { %v1818_v35 = vmul.f32 %v1816_v29, %v1806_v22  ;;  %v1817_v36 = vmul.f32 %v1815_v30, %v1809_v27 }
0x138e   :  { %v1820_v37 = vadd.f32 %v1818_v35, %v1806_v22  ;;  %v1819_v33 = vmul.f32 %v1817_v36, %v1809_v27 }
0x1390   :  { %v1822_v34 = vmul.f32 0.7978846, %v1820_v37  ;;  %v1821_v38 = vadd.f32 %v1819_v33, %v1809_v27 }
0x1392   :  { %2636 = vtanh.f32 %v1822_v34  ;;  %v1823_v42 = vmul.f32 0.7978846, %v1821_v38 }
0x1394   :  { %2638 = vtanh.f32 %v1823_v42 }
0x139c   :  { %v2637_v31 = vpop.eup %2636 }
0x139d   :  { %v1826_v32 = vadd.f32 1.0, %v2637_v31 }
0x139e   :  { %v2639_v26 = vpop.eup %2638 }
0x139f   :  { %v1827_v39 = vadd.f32 1.0, %v2639_v26  ;;  %v1828_v40 = vmul.f32 %v1826_v32, %v1812_v43 }
0x13a1   :  { %v1829_v41 = vmul.f32 %v1827_v39, %v1813_v44 }
0x13a3   :  { %v1830_v45 = vpack.c.bf16 %v1829_v41, %v1828_v40 }
0x13a5   :  { %2375 = vmatmul.mubr.msk.bf16.vlgmr.msra.gmra.mrb[28].mxu1 %vm522_vm3, %v1830_v45 }
0x1478   :  { %v1898_v49 = vpop.f32.mrb[28].mxu1 }
0x1479   :  { %v1899_v48 = vadd.f32 %v2124_v46, %v1898_v49  ;;  %v2376_v47 = vpop.f32.mrb[29].mxu1 }
0x147a   :  { %v1901_v50 = vpop.f32.mrb[30].mxu1 }
0x147b   :  { %v1902_v51 = vadd.f32 %v2124_v46, %v1901_v50  ;;  %v2377_v56 = vpop.f32.mrb[31].mxu1  ;;  %v1905_v52 = vadd.f32 %v1899_v48, %v1747_v11  ;;  %v2130_v11 = vld [vmem:[%s3255_s18 + $0x1] ss:$0 sm:$0xff] }
0x147d   :  { %v1907_v57 = vsel %vm73_vm0, %v1905_v52, 0.0  ;;  %v1906_v53 = vadd.f32 %v1902_v51, %v1748_v1 }
0x147e   :  { %1908 = vadd.xlane.f32.xlu0 %v1907_v57 }
0x147f   :  { %v1910_v54 = vsel %vm73_vm0, %v1906_v53, 0.0 }
0x1480   :  { %1911 = vadd.xlane.f32.xlu1 %v1910_v54 }
0x150b   :  { %v1909_v55 = vpop.xlane.xlu0 %1908 }
0x150c   :  { %v1913_v58 = vmul.f32 0.03125, %v1909_v55 }
0x150d   :  { %v1912_v12 = vpop.xlane.xlu1 %1911 }
0x150e   :  { %v1915_v13 = vsub.f32 %v1905_v52, %v1913_v58  ;;  %v1914_v60 = vmul.f32 0.03125, %v1912_v12 }
0x1510   :  { %v1916_v59 = vsub.f32 %v1906_v53, %v1914_v60  ;;  %v1917_v61 = vmul.f32 %v1915_v13, %v1915_v13 }
0x1512   :  { %v1919_v2 = vsel %vm73_vm0, %v1917_v61, 0.0  ;;  %v1918_v62 = vmul.f32 %v1916_v59, %v1916_v59 }
0x1513   :  { %1920 = vadd.xlane.f32.xlu0 %v1919_v2 }
0x1514   :  { %v1922_v63 = vsel %vm73_vm0, %v1918_v62, 0.0 }
0x1515   :  { %1923 = vadd.xlane.f32.xlu1 %v1922_v63 }
0x15a0   :  { %v1921_v4 = vpop.xlane.xlu0 %1920 }
0x15a1   :  { %v1925_v6 = vmul.f32 0.03125, %v1921_v4 }
0x15a2   :  { %v1924_v7 = vpop.xlane.xlu1 %1923 }
0x15a3   :  { %v1927_v5 = vadd.f32 1e-12, %v1925_v6  ;;  %v1926_v8 = vmul.f32 0.03125, %v1924_v7 }
0x15a5   :  { %2640 = vrsqrt.f32 %v1927_v5  ;;  %v1928_v9 = vadd.f32 1e-12, %v1926_v8 }
0x15a7   :  { %2642 = vrsqrt.f32 %v1928_v9 }
0x15af   :  { %v2641_v10 = vpop.eup %2640 }
0x15b0   :  { %v1931_v1 = vmul.f32 %v2641_v10, %v1915_v13 }
0x15b1   :  { %v2643_v14 = vpop.eup %2642 }
0x15b2   :  { %v1939_v16 = vmul.f32 %v2130_v11, %v1931_v1  ;;  %v1932_v17 = vmul.f32 %v2643_v14, %v1916_v59 }
0x15b4   :  { %v1940_v18 = vmul.f32 %v2130_v11, %v1932_v17  ;;  %v1947_v19 = vadd.f32 %v2131_v15, %v1939_v16 }
0x15b6   :  { %v1948_v20 = vadd.f32 %v2131_v15, %v1940_v18 }
0x15b8   :  { %v1949_v21 = vpack.c.bf16 %v1948_v20, %v1947_v19 }
0x15ba   :  { %2383 = vmatmul.mubr.msk.bf16.vlgmr.msra.gmra.mrb[48].mxu0 %vm73_vm0, %v1949_v21 }
0x168d   :  { %v2003_v22 = vpop.f32.mrb[48].mxu0 }
0x168e   :  { %2010 = vst [vmem:[%s3258_s21] sm:$0xff] %v2003_v22  ;;  %v2384_v23 = vpop.f32.mrb[49].mxu0 }
0x168f   :  { %v2006_v24 = vpop.f32.mrb[50].mxu0 }
0x1690   :  { %2011 = vst [vmem:[%s3258_s21 + $0x8] sm:$0xff] %v2006_v24  ;;  %v2385_v25 = vpop.f32.mrb[51].mxu0 }

</bundles_post_ra>
